<compile_context>
chip_gen: v7x
topology: tpu7x:2x2x1
jax: 0.10.0
libtpu: 0.0.40
codegen_flags: <defaults>
</compile_context>

<pallas_src>
import math
from functools import partial

import jax
import jax.numpy as jnp
from jax.experimental import pallas as pl
from jax.experimental.pallas import tpu as pltpu

F32 = jnp.float32
BF16 = jnp.bfloat16
BN_EPS = 1e-5
VMEM_LIMIT = 32 * 1024 * 1024   # safe on v5e/v6e (128 MiB) and v7x (64 MiB)


def _cparams(**kw):
    return pltpu.CompilerParams(vmem_limit_bytes=VMEM_LIMIT, **kw)


def _round_up(x, m):
    return ((x + m - 1) // m) * m


def _row_tiles(m):
    """Row tile + padded row count.  tm multiple of 16 (bf16 sublane packing),
    and >= 2 M blocks whenever possible so both v7x TensorCores get work."""
    tm = max(16, min(256, _round_up((m + 1) // 2, 16)))
    return tm, _round_up(m, tm)


# --------------------------------------------------------------------------
# Fused matmul kernels: C = A @ B (bf16 -> f32 acc), epilogue also emits the
# per-M-block column sum and sum-of-squares of C (for the following BatchNorm).
# Optional A-path fusion: A <- relu(A * scale + shift) (previous BN apply).
# --------------------------------------------------------------------------
def _mm_epilogue(acc_ref, o_ref, s_ref, q_ref):
    @pl.when(pl.program_id(2) == pl.num_programs(2) - 1)
    def _():
        out = acc_ref[...]
        o_ref[...] = out.astype(o_ref.dtype)
        srow = jnp.sum(out, axis=0, keepdims=True)          # (1, tn)
        qrow = jnp.sum(out * out, axis=0, keepdims=True)
        s_ref[...] = jnp.broadcast_to(srow[None], s_ref.shape)
        q_ref[...] = jnp.broadcast_to(qrow[None], q_ref.shape)


def _mm_kernel(a_ref, b_ref, o_ref, s_ref, q_ref, acc_ref):
    @pl.when(pl.program_id(2) == 0)
    def _():
        acc_ref[...] = jnp.zeros_like(acc_ref)

    acc_ref[...] += jnp.dot(a_ref[...], b_ref[...],
                            preferred_element_type=jnp.float32)
    _mm_epilogue(acc_ref, o_ref, s_ref, q_ref)


def _mm_bn_in_kernel(a_ref, b_ref, sc_ref, sh_ref, o_ref, s_ref, q_ref, acc_ref,
                     *, tm, valid_m, mask_rows):
    @pl.when(pl.program_id(2) == 0)
    def _():
        acc_ref[...] = jnp.zeros_like(acc_ref)

    a = a_ref[...].astype(jnp.float32) * sc_ref[...] + sh_ref[...]
    a = jnp.maximum(a, 0.0)
    if mask_rows:  # keep padded rows exactly zero (stats + output correctness)
        rows = (jax.lax.broadcasted_iota(jnp.int32, a.shape, 0)
                + pl.program_id(0) * tm)
        a = jnp.where(rows < valid_m, a, 0.0)
    acc_ref[...] += jnp.dot(a.astype(jnp.bfloat16), b_ref[...],
                            preferred_element_type=jnp.float32)
    _mm_epilogue(acc_ref, o_ref, s_ref, q_ref)


def matmul_bn(a, b, *, valid_m, in_scale=None, in_shift=None):
    """(M,K)@(K,N) -> bf16 (Mp,Np) plus per-M-block column sum / sumsq (f32)."""
    m, k = a.shape
    kb, nn = b.shape
    tm, mp = _row_tiles(valid_m)
    kp = _round_up(max(k, kb), 128)
    np_ = _round_up(nn, 128)
    tk = min(512, kp)
    tn = min(256, np_)
    n_m, n_n, n_k = mp // tm, np_ // tn, kp // tk

    a_p = jnp.pad(a.astype(BF16), ((0, mp - m), (0, kp - k)))
    b_p = jnp.pad(b.astype(BF16), ((0, kp - kb), (0, np_ - nn)))

    out_shape = (jax.ShapeDtypeStruct((mp, np_), BF16),
                 jax.ShapeDtypeStruct((n_m, 8, np_), F32),
                 jax.ShapeDtypeStruct((n_m, 8, np_), F32))
    out_specs = [pl.BlockSpec((tm, tn), lambda i, j, kk: (i, j)),
                 pl.BlockSpec((1, 8, tn), lambda i, j, kk: (i, 0, j)),
                 pl.BlockSpec((1, 8, tn), lambda i, j, kk: (i, 0, j))]
    a_spec = pl.BlockSpec((tm, tk), lambda i, j, kk: (i, kk))
    b_spec = pl.BlockSpec((tk, tn), lambda i, j, kk: (kk, j))

    if in_scale is None:
        kernel = _mm_kernel
        in_specs = [a_spec, b_spec]
        args = (a_p, b_p)
    else:
        sc = jnp.pad(in_scale.astype(F32), ((0, 0), (0, kp - in_scale.shape[1])))
        sh = jnp.pad(in_shift.astype(F32), ((0, 0), (0, kp - in_shift.shape[1])))
        kernel = partial(_mm_bn_in_kernel, tm=tm, valid_m=valid_m,
                         mask_rows=(mp > valid_m))
        in_specs = [a_spec, b_spec,
                    pl.BlockSpec((1, tk), lambda i, j, kk: (0, kk)),
                    pl.BlockSpec((1, tk), lambda i, j, kk: (0, kk))]
        args = (a_p, b_p, sc, sh)

    out, sums, sqs = pl.pallas_call(
        kernel,
        out_shape=out_shape,
        grid_spec=pltpu.PrefetchScalarGridSpec(
            num_scalar_prefetch=0,
            grid=(n_m, n_n, n_k),
            in_specs=in_specs,
            out_specs=out_specs,
            scratch_shapes=[pltpu.VMEM((tm, tn), jnp.float32)]),
        compiler_params=_cparams(
            dimension_semantics=("parallel", "parallel", "arbitrary")),
    )(*args)
    return out, sums, sqs


# --------------------------------------------------------------------------
# BN finalize (tiny (1,C) computation) -- plain JAX, no pallas launch.
# Padded channels have gamma=0 and zero sums -> scale=shift=0 (no leakage).
# --------------------------------------------------------------------------
def _bn_scale_shift(sums, sqs, gamma_p, beta_p, count):
    colsum = jnp.sum(sums[:, 0, :], axis=0, keepdims=True)     # (1, Np)
    colsq = jnp.sum(sqs[:, 0, :], axis=0, keepdims=True)
    mean = colsum / count
    var = jnp.maximum(colsq / count - mean * mean, 0.0)        # biased, like torch
    scale = gamma_p * jax.lax.rsqrt(var + BN_EPS)
    shift = beta_p - mean * scale
    return scale, shift


# --------------------------------------------------------------------------
# Fused bn3-apply + (downsample-bn apply) + residual add + ReLU.
# --------------------------------------------------------------------------
def _bn_add_relu_kernel(h_ref, r_ref, sc_ref, sh_ref, rsc_ref, rsh_ref, o_ref):
    y = h_ref[...].astype(jnp.float32) * sc_ref[...] + sh_ref[...]
    res = r_ref[...].astype(jnp.float32) * rsc_ref[...] + rsh_ref[...]
    o_ref[...] = jnp.maximum(y + res, 0.0).astype(o_ref.dtype)


def bn_add_relu(h, r, scale, shift, rscale, rshift, *, valid_m):
    mp, np_ = h.shape
    tm, mp2 = _row_tiles(valid_m)
    assert mp2 == mp and r.shape == (mp, np_)
    row = pl.BlockSpec((tm, np_), lambda i: (i, 0))
    vec = pl.BlockSpec((1, np_), lambda i: (0, 0))
    return pl.pallas_call(
        _bn_add_relu_kernel,
        out_shape=jax.ShapeDtypeStruct((mp, np_), F32),
        grid_spec=pltpu.PrefetchScalarGridSpec(
            num_scalar_prefetch=0,
            grid=(mp // tm,),
            in_specs=[row, row, vec, vec, vec, vec],
            out_specs=row),
        compiler_params=_cparams(dimension_semantics=("parallel",)),
    )(h, r, scale, shift, rscale, rshift)


# --------------------------------------------------------------------------
# 3x3 conv im2col glue (bf16, true channel width, bn1 already applied).
# --------------------------------------------------------------------------
def _im2col_3x3(x_nhwc, stride):
    n, h, w, c = x_nhwc.shape
    ho = (h + 2 - 3) // stride + 1
    wo = (w + 2 - 3) // stride + 1
    xp = jnp.pad(x_nhwc, ((0, 0), (1, 1), (1, 1), (0, 0)))
    cols = [xp[:, i:i + stride * (ho - 1) + 1:stride,
                  j:j + stride * (wo - 1) + 1:stride, :]
            for i in range(3) for j in range(3)]
    return jnp.concatenate(cols, axis=-1).reshape(n * ho * wo, 9 * c)


# --------------------------------------------------------------------------
# Bottleneck forward (matches the PyTorch module's forward, NCHW in / NCHW out).
# --------------------------------------------------------------------------
def bottleneck_forward(params, x_nchw, *, in_planes, out_planes, stride):
    cin, cmid, cout = in_planes, out_planes, 4 * out_planes
    cin_p = params["conv1_w"].shape[0]
    cout_p = params["conv3_w"].shape[1]

    n, _, h, w = x_nchw.shape
    x = jnp.transpose(x_nchw, (0, 2, 3, 1)).astype(F32)        # NCHW -> NHWC
    m0 = n * h * w
    _, mp0 = _row_tiles(m0)
    x2d = jnp.pad(x.reshape(m0, cin),
                  ((0, mp0 - m0), (0, cin_p - cin))).astype(BF16)

    # conv1 (1x1) with bn1 statistics fused into the matmul epilogue
    h1, s1, q1 = matmul_bn(x2d, params["conv1_w"], valid_m=m0)
    sc1, sh1 = _bn_scale_shift(s1, q1, params["bn1_g"], params["bn1_b"], m0)

    # bn1 apply + ReLU + im2col (one fused XLA pass feeding conv2's A operand)
    a1 = jnp.maximum(h1[:m0, :cmid].astype(F32) * sc1[:, :cmid] + sh1[:, :cmid],
                     0.0).astype(BF16)
    ho = (h + 2 - 3) // stride + 1
    wo = (w + 2 - 3) // stride + 1
    m1 = n * ho * wo
    patches = _im2col_3x3(a1.reshape(n, h, w, cmid), stride)   # (m1, 9*cmid) bf16

    # conv2 (3x3 as patch matmul) with bn2 statistics in the epilogue
    h2, s2, q2 = matmul_bn(patches, params["conv2_w"], valid_m=m1)
    sc2, sh2 = _bn_scale_shift(s2, q2, params["bn2_g"], params["bn2_b"], m1)

    # conv3 (1x1): bn2 apply + ReLU fused on the A path, bn3 stats in epilogue
    h3, s3, q3 = matmul_bn(h2, params["conv3_w"], valid_m=m1,
                           in_scale=sc2, in_shift=sh2)
    sc3, sh3 = _bn_scale_shift(s3, q3, params["bn3_g"], params["bn3_b"], m1)

    # residual branch
    _, mp1 = _row_tiles(m1)
    if "down_w" in params:
        xs = x[:, ::stride, ::stride, :]
        xs2d = jnp.pad(xs.reshape(m1, cin),
                       ((0, mp1 - m1), (0, cin_p - cin))).astype(BF16)
        r, sd, qd = matmul_bn(xs2d, params["down_w"], valid_m=m1)
        rsc, rsh = _bn_scale_shift(sd, qd, params["down_g"], params["down_b"], m1)
    else:
        assert cin == cout and stride == 1
        r = x2d                                               # identical padding
        rsc = jnp.ones((1, cout_p), F32)
        rsh = jnp.zeros((1, cout_p), F32)

    # fused bn3 + (down-bn) + residual add + ReLU
    yp = bn_add_relu(h3, r, sc3, sh3, rsc, rsh, valid_m=m1)    # (mp1, cout_p) f32
    y = yp[:m1, :cout].reshape(n, ho, wo, cout)
    return jnp.transpose(y, (0, 3, 1, 2))                      # NHWC -> NCHW


# --------------------------------------------------------------------------
# Parameters: weights pre-padded to 128-lane channels and pre-cast to bf16,
# gamma/beta zero-padded (pad channels stay exactly zero end-to-end).
# --------------------------------------------------------------------------
def _conv_weight(key, kh, kw, cin, cout):
    fan = kh * kw * cout
    return (math.sqrt(2.0 / fan) *
            jax.random.normal(key, (kh, kw, cin, cout), F32))


def _pad2(a, rows, cols):
    return jnp.pad(a, ((0, rows - a.shape[0]), (0, cols - a.shape[1])))


def _bn_params(c, cp):
    gamma = jnp.pad(jnp.ones((1, c), F32), ((0, 0), (0, cp - c)))
    beta = jnp.zeros((1, cp), F32)
    return gamma, beta


def make_bottleneck_params(key, in_planes, out_planes, stride):
    cin, cmid, cout = in_planes, out_planes, 4 * out_planes
    cin_p = _round_up(cin, 128)
    cmid_p = _round_up(cmid, 128)
    cout_p = _round_up(cout, 128)
    k1, k2, k3, k4 = jax.random.split(key, 4)
    w1 = _conv_weight(k1, 1, 1, cin, cmid).reshape(cin, cmid)
    w2 = _conv_weight(k2, 3, 3, cmid, cmid).reshape(9 * cmid, cmid)
    w3 = _conv_weight(k3, 1, 1, cmid, cout).reshape(cmid, cout)
    p = {
        "conv1_w": _pad2(w1, cin_p, cmid_p).astype(BF16),
        "conv2_w": _pad2(w2, _round_up(9 * cmid, 128), cmid_p).astype(BF16),
        "conv3_w": _pad2(w3, cmid_p, cout_p).astype(BF16),
    }
    p["bn1_g"], p["bn1_b"] = _bn_params(cmid, cmid_p)
    p["bn2_g"], p["bn2_b"] = _bn_params(cmid, cmid_p)
    p["bn3_g"], p["bn3_b"] = _bn_params(cout, cout_p)
    if stride != 1 or cin != cout:
        wd = _conv_weight(k4, 1, 1, cin, cout).reshape(cin, cout)
        p["down_w"] = _pad2(wd, cin_p, cout_p).astype(BF16)
        p["down_g"], p["down_b"] = _bn_params(cout, cout_p)
    return p


# --------------------------------------------------------------------------
# Pure-JAX reference (training-mode BN) for a numerical sanity check.
# --------------------------------------------------------------------------
def _ref_conv(x, w_hwio, stride, padding):
    return jax.lax.conv_general_dilated(
        x, w_hwio, window_strides=(stride, stride), padding=padding,
        dimension_numbers=("NCHW", "HWIO", "NCHW"))


def _ref_bn(z, gamma, beta):
    mean = z.mean(axis=(0, 2, 3), keepdims=True)
    var = z.var(axis=(0, 2, 3), keepdims=True)
    zn = (z - mean) * jax.lax.rsqrt(var + BN_EPS)
    return zn * gamma.reshape(1, -1, 1, 1) + beta.reshape(1, -1, 1, 1)


def ref_bottleneck(params, x, *, in_planes, out_planes, stride):
    cin, cmid, cout = in_planes, out_planes, 4 * out_planes
    w1 = params["conv1_w"][:cin, :cmid].astype(F32).reshape(1, 1, cin, cmid)
    w2 = params["conv2_w"][:9 * cmid, :cmid].astype(F32).reshape(3, 3, cmid, cmid)
    w3 = params["conv3_w"][:cmid, :cout].astype(F32).reshape(1, 1, cmid, cout)
    h = jax.nn.relu(_ref_bn(_ref_conv(x, w1, 1, "VALID"),
                            params["bn1_g"][0, :cmid], params["bn1_b"][0, :cmid]))
    h = jax.nn.relu(_ref_bn(_ref_conv(h, w2, stride, [(1, 1), (1, 1)]),
                            params["bn2_g"][0, :cmid], params["bn2_b"][0, :cmid]))
    h = _ref_bn(_ref_conv(h, w3, 1, "VALID"),
                params["bn3_g"][0, :cout], params["bn3_b"][0, :cout])
    if "down_w" in params:
        wd = params["down_w"][:cin, :cout].astype(F32).reshape(1, 1, cin, cout)
        r = _ref_bn(_ref_conv(x, wd, stride, "VALID"),
                    params["down_g"][0, :cout], params["down_b"][0, :cout])
    else:
        r = x
    return jax.nn.relu(h + r)


if __name__ == "__main__":
    key = jax.random.PRNGKey(0)
    k_pa, k_pb, k_x = jax.random.split(key, 3)

    # input: batch=2, in_planes=16, 16x16 spatial (NCHW, PyTorch convention)
    x = jax.random.normal(k_x, (2, 16, 16, 16), F32)

    # Case A: identity residual (downsample=None): in_planes == out_planes*4, stride=1
    params_a = make_bottleneck_params(k_pa, 16, 4, 1)
    fwd_a = jax.jit(partial(bottleneck_forward, in_planes=16, out_planes=4, stride=1))
    ya = jax.block_until_ready(fwd_a(params_a, x))
    assert ya.shape == (2, 16, 16, 16) and ya.dtype == jnp.float32
    assert bool(jnp.all(jnp.isfinite(ya)))
    ra = ref_bottleneck(params_a, x, in_planes=16, out_planes=4, stride=1)
    err_a = float(jnp.max(jnp.abs(ya - ra)))
    assert err_a < 0.3, f"case A max abs err vs reference: {err_a}"

    # Case B: downsample path (1x1 stride-2 conv + BN), channel expansion 16 -> 32
    params_b = make_bottleneck_params(k_pb, 16, 8, 2)
    fwd_b = jax.jit(partial(bottleneck_forward, in_planes=16, out_planes=8, stride=2))
    yb = jax.block_until_ready(fwd_b(params_b, x))
    assert yb.shape == (2, 32, 8, 8) and yb.dtype == jnp.float32
    assert bool(jnp.all(jnp.isfinite(yb)))
    rb = ref_bottleneck(params_b, x, in_planes=16, out_planes=8, stride=2)
    err_b = float(jnp.max(jnp.abs(yb - rb)))
    assert err_b < 0.3, f"case B max abs err vs reference: {err_b}"

    print("KERNEL_OK")
</pallas_src>

<mosaic_0001>
module attributes {stable_mosaic.version = 11 : i64} {
  func.func @_mm_kernel(%arg0: i32, %arg1: i32, %arg2: i32, %arg3: memref<256x128xbf16, #tpu.memory_space<vmem>>, %arg4: memref<128x128xbf16, #tpu.memory_space<vmem>>, %arg5: memref<256x128xbf16, #tpu.memory_space<vmem>>, %arg6: memref<1x8x128xf32, #tpu.memory_space<vmem>>, %arg7: memref<1x8x128xf32, #tpu.memory_space<vmem>>, %arg8: memref<256x128xf32, #tpu.memory_space<vmem>>) attributes {dimension_semantics = [#tpu.dimension_semantics<parallel>, #tpu.dimension_semantics<parallel>, #tpu.dimension_semantics<arbitrary>], iteration_bounds = array<i64: 2, 1, 1>, scalar_prefetch = 0 : i64, scratch_operands = 1 : i64, tpu.core_type = #tpu.core_type<tc>, window_params = [{transform_indices = @transform_0, window_bounds = array<i64: 256, 128>}, {transform_indices = @transform_1, window_bounds = array<i64: 128, 128>}, {transform_indices = @transform_2, window_bounds = array<i64: 256, 128>}, {transform_indices = @transform_3, window_bounds = array<i64: 1, 8, 128>}, {transform_indices = @transform_4, window_bounds = array<i64: 1, 8, 128>}]} {
    %c0_i32 = arith.constant 0 : i32
    %0 = arith.cmpi eq, %arg2, %c0_i32 : i32
    %1 = arith.extui %0 : i1 to i32
    %c0_i32_0 = arith.constant 0 : i32
    %2 = arith.cmpi ne, %1, %c0_i32_0 : i32
    scf.if %2 {
      %cst_10 = arith.constant 0.000000e+00 : f32
      %12 = vector.broadcast %cst_10 : f32 to vector<256x128xf32>
      %c0_11 = arith.constant 0 : index
      %c0_12 = arith.constant 0 : index
      %13 = vector.load %arg8[%c0_11, %c0_12] : memref<256x128xf32, #tpu.memory_space<vmem>>, vector<256x128xf32>
      tpu.vector_store %arg8[%c0_11, %c0_12], %12 {strides = array<i32>} : memref<256x128xf32, #tpu.memory_space<vmem>>, vector<256x128xf32>,
    } else {
    }
    %c0 = arith.constant 0 : index
    %c0_1 = arith.constant 0 : index
    %3 = vector.load %arg8[%c0, %c0_1] : memref<256x128xf32, #tpu.memory_space<vmem>>, vector<256x128xf32>
    %c0_2 = arith.constant 0 : index
    %c0_3 = arith.constant 0 : index
    %4 = vector.load %arg3[%c0_2, %c0_3] : memref<256x128xbf16, #tpu.memory_space<vmem>>, vector<256x128xbf16>
    %c0_4 = arith.constant 0 : index
    %c0_5 = arith.constant 0 : index
    %5 = vector.load %arg4[%c0_4, %c0_5] : memref<128x128xbf16, #tpu.memory_space<vmem>>, vector<128x128xbf16>
    %cst = arith.constant dense<0.000000e+00> : vector<256x128xf32>
    %6 = tpu.matmul %4, %5, %cst {dimension_numbers = #tpu.dot_dimension_numbers<[1], [0], [0], [1], [0, 0, 1, 1], [], []>} : vector<256x128xbf16>, vector<128x128xbf16>, vector<256x128xf32> -> vector<256x128xf32>
    %7 = arith.addf %3, %6 : vector<256x128xf32>
    %c0_6 = arith.constant 0 : index
    %c0_7 = arith.constant 0 : index
    %8 = vector.load %arg8[%c0_6, %c0_7] : memref<256x128xf32, #tpu.memory_space<vmem>>, vector<256x128xf32>
    tpu.vector_store %arg8[%c0_6, %c0_7], %7 {strides = array<i32>} : memref<256x128xf32, #tpu.memory_space<vmem>>, vector<256x128xf32>,
    %c0_i32_8 = arith.constant 0 : i32
    %9 = arith.cmpi eq, %arg2, %c0_i32_8 : i32
    %10 = arith.extui %9 : i1 to i32
    %c0_i32_9 = arith.constant 0 : i32
    %11 = arith.cmpi ne, %10, %c0_i32_9 : i32
    scf.if %11 {
      %c0_10 = arith.constant 0 : index
      %c0_11 = arith.constant 0 : index
      %12 = vector.load %arg8[%c0_10, %c0_11] : memref<256x128xf32, #tpu.memory_space<vmem>>, vector<256x128xf32>
      %13 = arith.truncf %12 : vector<256x128xf32> to vector<256x128xbf16>
      %c0_12 = arith.constant 0 : index
      %c0_13 = arith.constant 0 : index
      %14 = vector.load %arg5[%c0_12, %c0_13] : memref<256x128xbf16, #tpu.memory_space<vmem>>, vector<256x128xbf16>
      tpu.vector_store %arg5[%c0_12, %c0_13], %13 {strides = array<i32>} : memref<256x128xbf16, #tpu.memory_space<vmem>>, vector<256x128xbf16>,
      %cst_14 = arith.constant dense<0.000000e+00> : vector<128xf32>
      %15 = vector.multi_reduction <add>, %12, %cst_14 [0] : vector<256x128xf32> to vector<128xf32>
      %16 = vector.shape_cast %15 : vector<128xf32> to vector<1x128xf32>
      %17 = arith.mulf %12, %12 : vector<256x128xf32>
      %cst_15 = arith.constant dense<0.000000e+00> : vector<128xf32>
      %18 = vector.multi_reduction <add>, %17, %cst_15 [0] : vector<256x128xf32> to vector<128xf32>
      %19 = vector.shape_cast %18 : vector<128xf32> to vector<1x128xf32>
      %20 = vector.shape_cast %16 : vector<1x128xf32> to vector<1x1x128xf32>
      %21 = vector.shape_cast %20 : vector<1x1x128xf32> to vector<1x1x128xf32>
      %22 = vector.broadcast %21 : vector<1x1x128xf32> to vector<1x8x128xf32>
      %c0_16 = arith.constant 0 : index
      %c0_17 = arith.constant 0 : index
      %c0_18 = arith.constant 0 : index
      %23 = vector.load %arg6[%c0_16, %c0_17, %c0_18] : memref<1x8x128xf32, #tpu.memory_space<vmem>>, vector<1x8x128xf32>
      tpu.vector_store %arg6[%c0_16, %c0_17, %c0_18], %22 {strides = array<i32>} : memref<1x8x128xf32, #tpu.memory_space<vmem>>, vector<1x8x128xf32>,
      %24 = vector.shape_cast %19 : vector<1x128xf32> to vector<1x1x128xf32>
      %25 = vector.shape_cast %24 : vector<1x1x128xf32> to vector<1x1x128xf32>
      %26 = vector.broadcast %25 : vector<1x1x128xf32> to vector<1x8x128xf32>
      %c0_19 = arith.constant 0 : index
      %c0_20 = arith.constant 0 : index
      %c0_21 = arith.constant 0 : index
      %27 = vector.load %arg7[%c0_19, %c0_20, %c0_21] : memref<1x8x128xf32, #tpu.memory_space<vmem>>, vector<1x8x128xf32>
      tpu.vector_store %arg7[%c0_19, %c0_20, %c0_21], %26 {strides = array<i32>} : memref<1x8x128xf32, #tpu.memory_space<vmem>>, vector<1x8x128xf32>,
    } else {
    }
    return
  }
  func.func @transform_0(%arg0: i32, %arg1: i32, %arg2: i32) -> (i32, i32) {
    %c0_i32 = arith.constant 0 : i32
    return %arg0, %arg2 : i32, i32
  }
  func.func @transform_1(%arg0: i32, %arg1: i32, %arg2: i32) -> (i32, i32) {
    %c0_i32 = arith.constant 0 : i32
    return %arg2, %arg1 : i32, i32
  }
  func.func @transform_2(%arg0: i32, %arg1: i32, %arg2: i32) -> (i32, i32) {
    %c0_i32 = arith.constant 0 : i32
    return %arg0, %arg1 : i32, i32
  }
  func.func @transform_3(%arg0: i32, %arg1: i32, %arg2: i32) -> (i32, i32, i32) {
    %c0_i32 = arith.constant 0 : i32
    %c0_i32_0 = arith.constant 0 : i32
    return %arg0, %c0_i32, %arg1 : i32, i32, i32
  }
  func.func @transform_4(%arg0: i32, %arg1: i32, %arg2: i32) -> (i32, i32, i32) {
    %c0_i32 = arith.constant 0 : i32
    %c0_i32_0 = arith.constant 0 : i32
    return %arg0, %c0_i32, %arg1 : i32, i32, i32
  }
}

module attributes {stable_mosaic.version = 11 : i64} {
  func.func @_mm_bn_in_kernel(%arg0: i32, %arg1: i32, %arg2: i32, %arg3: memref<256x128xbf16, #tpu.memory_space<vmem>>, %arg4: memref<128x128xbf16, #tpu.memory_space<vmem>>, %arg5: memref<1x128xf32, #tpu.memory_space<vmem>>, %arg6: memref<1x128xf32, #tpu.memory_space<vmem>>, %arg7: memref<256x128xbf16, #tpu.memory_space<vmem>>, %arg8: memref<1x8x128xf32, #tpu.memory_space<vmem>>, %arg9: memref<1x8x128xf32, #tpu.memory_space<vmem>>, %arg10: memref<256x128xf32, #tpu.memory_space<vmem>>) attributes {dimension_semantics = [#tpu.dimension_semantics<parallel>, #tpu.dimension_semantics<parallel>, #tpu.dimension_semantics<arbitrary>], iteration_bounds = array<i64: 2, 1, 1>, scalar_prefetch = 0 : i64, scratch_operands = 1 : i64, tpu.core_type = #tpu.core_type<tc>, window_params = [{transform_indices = @transform_0, window_bounds = array<i64: 256, 128>}, {transform_indices = @transform_1, window_bounds = array<i64: 128, 128>}, {transform_indices = @transform_2, window_bounds = array<i64: 1, 128>}, {transform_indices = @transform_3, window_bounds = array<i64: 1, 128>}, {transform_indices = @transform_4, window_bounds = array<i64: 256, 128>}, {transform_indices = @transform_5, window_bounds = array<i64: 1, 8, 128>}, {transform_indices = @transform_6, window_bounds = array<i64: 1, 8, 128>}]} {
    %c0_i32 = arith.constant 0 : i32
    %0 = arith.cmpi eq, %arg2, %c0_i32 : i32
    %1 = arith.extui %0 : i1 to i32
    %c0_i32_0 = arith.constant 0 : i32
    %2 = arith.cmpi ne, %1, %c0_i32_0 : i32
    scf.if %2 {
      %cst_15 = arith.constant 0.000000e+00 : f32
      %22 = vector.broadcast %cst_15 : f32 to vector<256x128xf32>
      %c0_16 = arith.constant 0 : index
      %c0_17 = arith.constant 0 : index
      %23 = vector.load %arg10[%c0_16, %c0_17] : memref<256x128xf32, #tpu.memory_space<vmem>>, vector<256x128xf32>
      tpu.vector_store %arg10[%c0_16, %c0_17], %22 {strides = array<i32>} : memref<256x128xf32, #tpu.memory_space<vmem>>, vector<256x128xf32>,
    } else {
    }
    %c0 = arith.constant 0 : index
    %c0_1 = arith.constant 0 : index
    %3 = vector.load %arg3[%c0, %c0_1] : memref<256x128xbf16, #tpu.memory_space<vmem>>, vector<256x128xbf16>
    %4 = arith.extf %3 : vector<256x128xbf16> to vector<256x128xf32>
    %c0_2 = arith.constant 0 : index
    %c0_3 = arith.constant 0 : index
    %5 = vector.load %arg5[%c0_2, %c0_3] : memref<1x128xf32, #tpu.memory_space<vmem>>, vector<1x128xf32>
    %6 = vector.broadcast %5 : vector<1x128xf32> to vector<256x128xf32>
    %7 = arith.mulf %4, %6 : vector<256x128xf32>
    %c0_4 = arith.constant 0 : index
    %c0_5 = arith.constant 0 : index
    %8 = vector.load %arg6[%c0_4, %c0_5] : memref<1x128xf32, #tpu.memory_space<vmem>>, vector<1x128xf32>
    %9 = vector.broadcast %8 : vector<1x128xf32> to vector<256x128xf32>
    %10 = arith.addf %7, %9 : vector<256x128xf32>
    %cst = arith.constant 0.000000e+00 : f32
    %11 = vector.broadcast %cst : f32 to vector<256x128xf32>
    %12 = arith.maximumf %10, %11 : vector<256x128xf32>
    %c0_6 = arith.constant 0 : index
    %c0_7 = arith.constant 0 : index
    %13 = vector.load %arg10[%c0_6, %c0_7] : memref<256x128xf32, #tpu.memory_space<vmem>>, vector<256x128xf32>
    %14 = arith.truncf %12 : vector<256x128xf32> to vector<256x128xbf16>
    %c0_8 = arith.constant 0 : index
    %c0_9 = arith.constant 0 : index
    %15 = vector.load %arg4[%c0_8, %c0_9] : memref<128x128xbf16, #tpu.memory_space<vmem>>, vector<128x128xbf16>
    %cst_10 = arith.constant dense<0.000000e+00> : vector<256x128xf32>
    %16 = tpu.matmul %14, %15, %cst_10 {dimension_numbers = #tpu.dot_dimension_numbers<[1], [0], [0], [1], [0, 0, 1, 1], [], []>} : vector<256x128xbf16>, vector<128x128xbf16>, vector<256x128xf32> -> vector<256x128xf32>
    %17 = arith.addf %13, %16 : vector<256x128xf32>
    %c0_11 = arith.constant 0 : index
    %c0_12 = arith.constant 0 : index
    %18 = vector.load %arg10[%c0_11, %c0_12] : memref<256x128xf32, #tpu.memory_space<vmem>>, vector<256x128xf32>
    tpu.vector_store %arg10[%c0_11, %c0_12], %17 {strides = array<i32>} : memref<256x128xf32, #tpu.memory_space<vmem>>, vector<256x128xf32>,
    %c0_i32_13 = arith.constant 0 : i32
    %19 = arith.cmpi eq, %arg2, %c0_i32_13 : i32
    %20 = arith.extui %19 : i1 to i32
    %c0_i32_14 = arith.constant 0 : i32
    %21 = arith.cmpi ne, %20, %c0_i32_14 : i32
    scf.if %21 {
      %c0_15 = arith.constant 0 : index
      %c0_16 = arith.constant 0 : index
      %22 = vector.load %arg10[%c0_15, %c0_16] : memref<256x128xf32, #tpu.memory_space<vmem>>, vector<256x128xf32>
      %23 = arith.truncf %22 : vector<256x128xf32> to vector<256x128xbf16>
      %c0_17 = arith.constant 0 : index
      %c0_18 = arith.constant 0 : index
      %24 = vector.load %arg7[%c0_17, %c0_18] : memref<256x128xbf16, #tpu.memory_space<vmem>>, vector<256x128xbf16>
      tpu.vector_store %arg7[%c0_17, %c0_18], %23 {strides = array<i32>} : memref<256x128xbf16, #tpu.memory_space<vmem>>, vector<256x128xbf16>,
      %cst_19 = arith.constant dense<0.000000e+00> : vector<128xf32>
      %25 = vector.multi_reduction <add>, %22, %cst_19 [0] : vector<256x128xf32> to vector<128xf32>
      %26 = vector.shape_cast %25 : vector<128xf32> to vector<1x128xf32>
      %27 = arith.mulf %22, %22 : vector<256x128xf32>
      %cst_20 = arith.constant dense<0.000000e+00> : vector<128xf32>
      %28 = vector.multi_reduction <add>, %27, %cst_20 [0] : vector<256x128xf32> to vector<128xf32>
      %29 = vector.shape_cast %28 : vector<128xf32> to vector<1x128xf32>
      %30 = vector.shape_cast %26 : vector<1x128xf32> to vector<1x1x128xf32>
      %31 = vector.shape_cast %30 : vector<1x1x128xf32> to vector<1x1x128xf32>
      %32 = vector.broadcast %31 : vector<1x1x128xf32> to vector<1x8x128xf32>
      %c0_21 = arith.constant 0 : index
      %c0_22 = arith.constant 0 : index
      %c0_23 = arith.constant 0 : index
      %33 = vector.load %arg8[%c0_21, %c0_22, %c0_23] : memref<1x8x128xf32, #tpu.memory_space<vmem>>, vector<1x8x128xf32>
      tpu.vector_store %arg8[%c0_21, %c0_22, %c0_23], %32 {strides = array<i32>} : memref<1x8x128xf32, #tpu.memory_space<vmem>>, vector<1x8x128xf32>,
      %34 = vector.shape_cast %29 : vector<1x128xf32> to vector<1x1x128xf32>
      %35 = vector.shape_cast %34 : vector<1x1x128xf32> to vector<1x1x128xf32>
      %36 = vector.broadcast %35 : vector<1x1x128xf32> to vector<1x8x128xf32>
      %c0_24 = arith.constant 0 : index
      %c0_25 = arith.constant 0 : index
      %c0_26 = arith.constant 0 : index
      %37 = vector.load %arg9[%c0_24, %c0_25, %c0_26] : memref<1x8x128xf32, #tpu.memory_space<vmem>>, vector<1x8x128xf32>
      tpu.vector_store %arg9[%c0_24, %c0_25, %c0_26], %36 {strides = array<i32>} : memref<1x8x128xf32, #tpu.memory_space<vmem>>, vector<1x8x128xf32>,
    } else {
    }
    return
  }
  func.func @transform_0(%arg0: i32, %arg1: i32, %arg2: i32) -> (i32, i32) {
    %c0_i32 = arith.constant 0 : i32
    return %arg0, %arg2 : i32, i32
  }
  func.func @transform_1(%arg0: i32, %arg1: i32, %arg2: i32) -> (i32, i32) {
    %c0_i32 = arith.constant 0 : i32
    return %arg2, %arg1 : i32, i32
  }
  func.func @transform_2(%arg0: i32, %arg1: i32, %arg2: i32) -> (i32, i32) {
    %c0_i32 = arith.constant 0 : i32
    %c0_i32_0 = arith.constant 0 : i32
    return %c0_i32, %arg2 : i32, i32
  }
  func.func @transform_3(%arg0: i32, %arg1: i32, %arg2: i32) -> (i32, i32) {
    %c0_i32 = arith.constant 0 : i32
    %c0_i32_0 = arith.constant 0 : i32
    return %c0_i32, %arg2 : i32, i32
  }
  func.func @transform_4(%arg0: i32, %arg1: i32, %arg2: i32) -> (i32, i32) {
    %c0_i32 = arith.constant 0 : i32
    return %arg0, %arg1 : i32, i32
  }
  func.func @transform_5(%arg0: i32, %arg1: i32, %arg2: i32) -> (i32, i32, i32) {
    %c0_i32 = arith.constant 0 : i32
    %c0_i32_0 = arith.constant 0 : i32
    return %arg0, %c0_i32, %arg1 : i32, i32, i32
  }
  func.func @transform_6(%arg0: i32, %arg1: i32, %arg2: i32) -> (i32, i32, i32) {
    %c0_i32 = arith.constant 0 : i32
    %c0_i32_0 = arith.constant 0 : i32
    return %arg0, %c0_i32, %arg1 : i32, i32, i32
  }
}

module attributes {stable_mosaic.version = 11 : i64} {
  func.func @_bn_add_relu_kernel(%arg0: i32, %arg1: memref<256x128xbf16, #tpu.memory_space<vmem>>, %arg2: memref<256x128xbf16, #tpu.memory_space<vmem>>, %arg3: memref<1x128xf32, #tpu.memory_space<vmem>>, %arg4: memref<1x128xf32, #tpu.memory_space<vmem>>, %arg5: memref<1x128xf32, #tpu.memory_space<vmem>>, %arg6: memref<1x128xf32, #tpu.memory_space<vmem>>, %arg7: memref<256x128xf32, #tpu.memory_space<vmem>>) attributes {dimension_semantics = [#tpu.dimension_semantics<parallel>], iteration_bounds = array<i64: 2>, scalar_prefetch = 0 : i64, scratch_operands = 0 : i64, tpu.core_type = #tpu.core_type<tc>, window_params = [{transform_indices = @transform_0, window_bounds = array<i64: 256, 128>}, {transform_indices = @transform_1, window_bounds = array<i64: 256, 128>}, {pipeline_mode = #tpu.pipeline_mode<synchronous>, transform_indices = @transform_2, window_bounds = array<i64: 1, 128>}, {pipeline_mode = #tpu.pipeline_mode<synchronous>, transform_indices = @transform_3, window_bounds = array<i64: 1, 128>}, {pipeline_mode = #tpu.pipeline_mode<synchronous>, transform_indices = @transform_4, window_bounds = array<i64: 1, 128>}, {pipeline_mode = #tpu.pipeline_mode<synchronous>, transform_indices = @transform_5, window_bounds = array<i64: 1, 128>}, {transform_indices = @transform_6, window_bounds = array<i64: 256, 128>}]} {
    %c0 = arith.constant 0 : index
    %c0_0 = arith.constant 0 : index
    %0 = vector.load %arg1[%c0, %c0_0] : memref<256x128xbf16, #tpu.memory_space<vmem>>, vector<256x128xbf16>
    %1 = arith.extf %0 : vector<256x128xbf16> to vector<256x128xf32>
    %c0_1 = arith.constant 0 : index
    %c0_2 = arith.constant 0 : index
    %2 = vector.load %arg3[%c0_1, %c0_2] : memref<1x128xf32, #tpu.memory_space<vmem>>, vector<1x128xf32>
    %3 = vector.broadcast %2 : vector<1x128xf32> to vector<256x128xf32>
    %4 = arith.mulf %1, %3 : vector<256x128xf32>
    %c0_3 = arith.constant 0 : index
    %c0_4 = arith.constant 0 : index
    %5 = vector.load %arg4[%c0_3, %c0_4] : memref<1x128xf32, #tpu.memory_space<vmem>>, vector<1x128xf32>
    %6 = vector.broadcast %5 : vector<1x128xf32> to vector<256x128xf32>
    %7 = arith.addf %4, %6 : vector<256x128xf32>
    %c0_5 = arith.constant 0 : index
    %c0_6 = arith.constant 0 : index
    %8 = vector.load %arg2[%c0_5, %c0_6] : memref<256x128xbf16, #tpu.memory_space<vmem>>, vector<256x128xbf16>
    %9 = arith.extf %8 : vector<256x128xbf16> to vector<256x128xf32>
    %c0_7 = arith.constant 0 : index
    %c0_8 = arith.constant 0 : index
    %10 = vector.load %arg5[%c0_7, %c0_8] : memref<1x128xf32, #tpu.memory_space<vmem>>, vector<1x128xf32>
    %11 = vector.broadcast %10 : vector<1x128xf32> to vector<256x128xf32>
    %12 = arith.mulf %9, %11 : vector<256x128xf32>
    %c0_9 = arith.constant 0 : index
    %c0_10 = arith.constant 0 : index
    %13 = vector.load %arg6[%c0_9, %c0_10] : memref<1x128xf32, #tpu.memory_space<vmem>>, vector<1x128xf32>
    %14 = vector.broadcast %13 : vector<1x128xf32> to vector<256x128xf32>
    %15 = arith.addf %12, %14 : vector<256x128xf32>
    %16 = arith.addf %7, %15 : vector<256x128xf32>
    %cst = arith.constant 0.000000e+00 : f32
    %17 = vector.broadcast %cst : f32 to vector<256x128xf32>
    %18 = arith.maximumf %16, %17 : vector<256x128xf32>
    %c0_11 = arith.constant 0 : index
    %c0_12 = arith.constant 0 : index
    %19 = vector.load %arg7[%c0_11, %c0_12] : memref<256x128xf32, #tpu.memory_space<vmem>>, vector<256x128xf32>
    tpu.vector_store %arg7[%c0_11, %c0_12], %18 {strides = array<i32>} : memref<256x128xf32, #tpu.memory_space<vmem>>, vector<256x128xf32>,
    return
  }
  func.func @transform_0(%arg0: i32) -> (i32, i32) {
    %c0_i32 = arith.constant 0 : i32
    %c0_i32_0 = arith.constant 0 : i32
    return %arg0, %c0_i32 : i32, i32
  }
  func.func @transform_1(%arg0: i32) -> (i32, i32) {
    %c0_i32 = arith.constant 0 : i32
    %c0_i32_0 = arith.constant 0 : i32
    return %arg0, %c0_i32 : i32, i32
  }
  func.func @transform_2(%arg0: i32) -> (i32, i32) {
    %c0_i32 = arith.constant 0 : i32
    %c0_i32_0 = arith.constant 0 : i32
    %c0_i32_1 = arith.constant 0 : i32
    return %c0_i32, %c0_i32_0 : i32, i32
  }
  func.func @transform_3(%arg0: i32) -> (i32, i32) {
    %c0_i32 = arith.constant 0 : i32
    %c0_i32_0 = arith.constant 0 : i32
    %c0_i32_1 = arith.constant 0 : i32
    return %c0_i32, %c0_i32_0 : i32, i32
  }
  func.func @transform_4(%arg0: i32) -> (i32, i32) {
    %c0_i32 = arith.constant 0 : i32
    %c0_i32_0 = arith.constant 0 : i32
    %c0_i32_1 = arith.constant 0 : i32
    return %c0_i32, %c0_i32_0 : i32, i32
  }
  func.func @transform_5(%arg0: i32) -> (i32, i32) {
    %c0_i32 = arith.constant 0 : i32
    %c0_i32_0 = arith.constant 0 : i32
    %c0_i32_1 = arith.constant 0 : i32
    return %c0_i32, %c0_i32_0 : i32, i32
  }
  func.func @transform_6(%arg0: i32) -> (i32, i32) {
    %c0_i32 = arith.constant 0 : i32
    %c0_i32_0 = arith.constant 0 : i32
    return %arg0, %c0_i32 : i32, i32
  }
}

</mosaic_0001>

<bundles_post_ra>
// kernel: bottleneck_forward.4
= control target key start
LH: loop header
LB: loop body
LE: loop exit
PB: predicated region body
PF: predicated region fallthrough
CT: control target
= control target key end

     0   :  { %s1661_s15 = smov 0   ;;  %s1663_s16 = smov 0   ;;  %s1856_s0 = inlined_call_operand.vmem [shape: bf16[512,128], index: 0, kind: input, shape index: {}]   ;;  %s1857_s1 = inlined_call_operand.vmem [shape: bf16[128,128], index: 1, kind: input, shape index: {}]   ;;  %s1858_s2 = inlined_call_operand.vmem [shape: bf16[512,128], index: 2, kind: output, shape index: {0}]   ;;  %s1859_s3 = inlined_call_operand.vmem [shape: f32[2,8,128], index: 3, kind: output, shape index: {1}]   ;;  %s1860_s4 = inlined_call_operand.vmem [shape: f32[2,8,128], index: 4, kind: output, shape index: {2}]  }
   0x1   :  { %s1665_s17 = smov 0  }
   0x2 LB: > { %s34_s18 = sadd.s32 1, %s1630_s16  ;;  %p1284_p0 = scmp.ge.s32.totalorder %s1634_s17, 1  ;;  %s1634_s17 = sphi %s1665_s17, %s15_s17   ;;  %s1630_s16 = sphi %s1663_s16, %s1862_s16   ;;  %s1626_s15 = sphi %s1661_s15, %s1861_s15  }
   0x3   : > { %p36_p1 = scmp.ge.s32.totalorder %s34_s18, 2  ;;  %p214_p2 = scmp.lt.s32.totalorder %s1634_s17, 3 }
   0x5   : > { %s1864_s18 = smov (%p36_p1, %s34_s18), 0  ;;  %p215_p3 = pnand %p1284_p0, %p214_p2 }
   0x6   : > { %v1588_v0 = vld [vmem:[%s1857_s1] sm:$0xff] (!%p215_p3)   ;;  %s1285_s21 = sshll.u32 (!%p215_p3), %s1626_s15, 5  ;;  %v1589_v1 = vld [vmem:[%s1857_s1 + $0x8] sm:$0xff] (!%p215_p3)   ;;  %v1590_v2 = vld [vmem:[%s1857_s1 + $0x10] sm:$0xff] (!%p215_p3)   ;;  %p295_p5 = scmp.lt.s32.totalorder (!%p215_p3), %s1626_s15, 1 }
   0x7   : > { %218 = sbr.rel (%p215_p3) target bundleno = 331 (0x14b), region = 28  ;;  %p269_p4 = scmp.lt.s32.totalorder (!%p215_p3), %s1285_s21, 63  ;;  %1500 = vmatprep.subr.bf16.mxu0 (!%p215_p3), %v1588_v0  ;;  %1548 = vmatprep.subr.bf16.mxu1 (!%p215_p3), %v1588_v0  ;;  %v1591_v3 = vld [vmem:[%s1857_s1 + $0x18] sm:$0xff] (!%p215_p3)   ;;  %v1592_v5 = vld [vmem:[%s1857_s1 + $0x20] sm:$0xff] (!%p215_p3)   ;;  %v1593_v6 = vld [vmem:[%s1857_s1 + $0x28] sm:$0xff] (!%p215_p3)  }
   0x8   : > { %1501 = vmatpush3.bf16.msra.mxu0 (!%p215_p3), %v1588_v0  ;;  %1556 = vmatpush3.bf16.msra.mxu1 (!%p215_p3), %v1588_v0  ;;  %v1594_v8 = vld [vmem:[%s1857_s1 + $0x30] sm:$0xff] (!%p215_p3)   ;;  %v1595_v9 = vld [vmem:[%s1857_s1 + $0x38] sm:$0xff] (!%p215_p3)  }
   0x9   : > { %1502 = vmatprep.subr.bf16.mxu0 (!%p215_p3), %v1589_v1  ;;  %1549 = vmatprep.subr.bf16.mxu1 (!%p215_p3), %v1589_v1 }
   0xc   : > { %1503 = vmatpush3.bf16.msra.mxu0 (!%p215_p3), %v1589_v1  ;;  %1557 = vmatpush3.bf16.msra.mxu1 (!%p215_p3), %v1589_v1 }
   0xd   : > { %1504 = vmatprep.subr.bf16.mxu0 (!%p215_p3), %v1590_v2  ;;  %1550 = vmatprep.subr.bf16.mxu1 (!%p215_p3), %v1590_v2 }
   0xe   : > { %s1866_s21 = smov (!%p269_p4, %s1285_s21), 63  ;;  %s1868_s15 = smov (!%p295_p5, %s1626_s15), 1 }
   0xf   : > { %s1286_s26 = sshll.u32 %s1866_s21, 2  ;;  %s1289_s21 = sshll.u32 %s1868_s15, 3 }
  0x10   : > { %s1699_s29 = scalar_lea.vmem %s1856_s0, %s1286_s26  ;;  %1505 = vmatpush3.bf16.msra.mxu0 %v1590_v2  ;;  %1558 = vmatpush3.bf16.msra.mxu1 %v1590_v2  ;;  %s1741_s20 = scalar_lea.vmem %s1858_s2, %s1286_s26 }
  0x11   : > { %v1596_v4 = vld [vmem:[%s1699_s29] sm:$0xff]   ;;  %1506 = vmatprep.subr.bf16.mxu0 %v1591_v3  ;;  %1551 = vmatprep.subr.bf16.mxu1 %v1591_v3  ;;  %v1597_v10 = vld [vmem:[%s1699_s29 + $0x8] sm:$0xff]   ;;  %v1598_v12 = vld [vmem:[%s1699_s29 + $0x10] sm:$0xff]   ;;  %s301_s24 = scalar_lea.vmem %s1859_s3, %s1289_s21  ;;  %s308_s27 = scalar_lea.vmem %s1860_s4, %s1289_s21 }
  0x12   : > { %1516 = vmatprep.mubr.bf16.mxu0 %v1596_v4  ;;  %v1604_v7 = vld [vmem:[%s1699_s29 + $0x40] sm:$0xff]   ;;  %v1605_v11 = vld [vmem:[%s1699_s29 + $0x48] sm:$0xff]   ;;  %v1606_v13 = vld [vmem:[%s1699_s29 + $0x50] sm:$0xff]  }
  0x13   : > { %1532 = vmatprep.mubr.bf16.mxu1 %v1604_v7  ;;  %v1599_v14 = vld [vmem:[%s1699_s29 + $0x18] sm:$0xff]   ;;  %v1600_v16 = vld [vmem:[%s1699_s29 + $0x20] sm:$0xff]   ;;  %v1601_v18 = vld [vmem:[%s1699_s29 + $0x28] sm:$0xff]  }
  0x14   : > { %1507 = vmatpush3.bf16.msra.mxu0 %v1591_v3  ;;  %1559 = vmatpush3.bf16.msra.mxu1 %v1591_v3  ;;  %v1607_v15 = vld [vmem:[%s1699_s29 + $0x58] sm:$0xff]   ;;  %v1608_v17 = vld [vmem:[%s1699_s29 + $0x60] sm:$0xff]   ;;  %v1609_v19 = vld [vmem:[%s1699_s29 + $0x68] sm:$0xff]  }
  0x15   : > { %1508 = vmatprep.subr.bf16.mxu0 %v1592_v5  ;;  %1552 = vmatprep.subr.bf16.mxu1 %v1592_v5  ;;  %v1602_v20 = vld [vmem:[%s1699_s29 + $0x30] sm:$0xff]   ;;  %v1603_v22 = vld [vmem:[%s1699_s29 + $0x38] sm:$0xff]  }
  0x16   : > { %v1610_v21 = vld [vmem:[%s1699_s29 + $0x70] sm:$0xff]   ;;  %v1611_v23 = vld [vmem:[%s1699_s29 + $0x78] sm:$0xff]  }
  0x18   : > { %1509 = vmatpush3.bf16.msra.mxu0 %v1592_v5  ;;  %1560 = vmatpush3.bf16.msra.mxu1 %v1592_v5 }
  0x19   : > { %1510 = vmatprep.subr.bf16.mxu0 %v1593_v6  ;;  %1553 = vmatprep.subr.bf16.mxu1 %v1593_v6 }
  0x1c   : > { %1511 = vmatpush3.bf16.msra.mxu0 %v1593_v6  ;;  %1561 = vmatpush3.bf16.msra.mxu1 %v1593_v6 }
  0x1d   : > { %1512 = vmatprep.subr.bf16.mxu0 %v1594_v8  ;;  %1554 = vmatprep.subr.bf16.mxu1 %v1594_v8 }
  0x20   : > { %1513 = vmatpush3.bf16.msra.mxu0 %v1594_v8  ;;  %1562 = vmatpush3.bf16.msra.mxu1 %v1594_v8 }
  0x21   : > { %1514 = vmatprep.subr.bf16.mxu0 %v1595_v9  ;;  %1555 = vmatprep.subr.bf16.mxu1 %v1595_v9 }
  0x24   : > { %1515 = vmatpush3.bf16.msra.mxu0 %v1595_v9  ;;  %1563 = vmatpush3.bf16.msra.mxu1 %v1595_v9 }
  0x27   : > { %1517 = vmatmul.mubr.bf16.vlgmr.msra.gmra.mrb[0].mxu0 %v1597_v10  ;;  %1533 = vmatmul.mubr.bf16.vlgmr.msra.gmra.mrb[0].mxu1 %v1605_v11 }
  0x28   : > { %1520 = vmatprep.mubr.bf16.mxu0 %v1598_v12  ;;  %1536 = vmatprep.mubr.bf16.mxu1 %v1606_v13 }
  0x2f   : > { %1521 = vmatmul.mubr.bf16.gmra.mrb[4].mxu0 %v1599_v14  ;;  %1537 = vmatmul.mubr.bf16.gmra.mrb[4].mxu1 %v1607_v15 }
  0x30   : > { %1524 = vmatprep.mubr.bf16.mxu0 %v1600_v16  ;;  %1540 = vmatprep.mubr.bf16.mxu1 %v1608_v17 }
  0x37   : > { %1525 = vmatmul.mubr.bf16.gmra.mrb[8].mxu0 %v1601_v18  ;;  %1541 = vmatmul.mubr.bf16.gmra.mrb[8].mxu1 %v1609_v19 }
  0x38   : > { %1528 = vmatprep.mubr.bf16.mxu0 %v1602_v20  ;;  %1544 = vmatprep.mubr.bf16.mxu1 %v1610_v21 }
  0x3f   : > { %1529 = vmatmul.mubr.bf16.gmra.mrb[12].mxu0 %v1603_v22  ;;  %1545 = vmatmul.mubr.bf16.gmra.mrb[12].mxu1 %v1611_v23 }
  0xfa   : > { %v1518_v24 = vpop.f32.mrb[0].mxu0  ;;  %v1732_v25 = vpop.f32.mrb[0].mxu1 }
  0xfb   : > { %v604_v26 = vpop.f32.mrb[1].mxu0  ;;  %v1734_v27 = vpop.f32.mrb[1].mxu1  ;;  %v1029_v39 = vmul.f32 %v1518_v24, %v1518_v24 }
  0xfc   : > { %v1519_v28 = vpop.f32.mrb[2].mxu0  ;;  %v1743_v29 = vpop.f32.mrb[2].mxu1  ;;  %v1027_v30 = vmul.f32 %v604_v26, %v604_v26 }
  0xfd   : > { %v1389_v31 = vpack.c.bf16 %v1519_v28, %v1518_v24  ;;  %v607_v32 = vpop.f32.mrb[3].mxu0  ;;  %v1429_v33 = vpack.c.bf16 %v1743_v29, %v1732_v25  ;;  %v1747_v34 = vpop.f32.mrb[3].mxu1  ;;  %v1030_v42 = vmul.f32 %v1519_v28, %v1519_v28 }
  0xfe   : > { %v1384_v35 = vpack.c.bf16 %v607_v32, %v604_v26  ;;  %v990_v36 = vadd.f32 %v607_v32, %v604_v26  ;;  %v1028_v37 = vmul.f32 %v607_v32, %v607_v32  ;;  %v1424_v38 = vpack.c.bf16 %v1747_v34, %v1734_v27 }
  0xff   : > { %1461 = vst [vmem:[%s1741_s20 + $0x8] sm:$0xff] %v1389_v31   ;;  %1469 = vst [vmem:[%s1741_s20 + $0x48] sm:$0xff] %v1429_v33  }
 0x100   : > { %1385 = vst [vmem:[%s1741_s20] sm:$0xff] %v1384_v35   ;;  %v991_v40 = vadd.f32 %v1518_v24, %v990_v36  ;;  %v1059_v41 = vadd.f32 %v1028_v37, %v1027_v30  ;;  %1468 = vst [vmem:[%s1741_s20 + $0x40] sm:$0xff] %v1424_v38  }
 0x102   : > { %v1060_v43 = vadd.f32 %v1059_v41, %v1029_v39  ;;  %v1522_v44 = vpop.f32.mrb[4].mxu0  ;;  %v992_v45 = vadd.f32 %v1519_v28, %v991_v40  ;;  %v1755_v46 = vpop.f32.mrb[4].mxu1 }
 0x103   : > { %v620_v47 = vpop.f32.mrb[5].mxu0  ;;  %v1757_v48 = vpop.f32.mrb[5].mxu1  ;;  %v1033_v63 = vmul.f32 %v1522_v44, %v1522_v44 }
 0x104   : > { %v993_v49 = vadd.f32 %v992_v45, %v620_v47  ;;  %v1031_v50 = vmul.f32 %v620_v47, %v620_v47  ;;  %v1061_v51 = vadd.f32 %v1060_v43, %v1030_v42  ;;  %v1523_v52 = vpop.f32.mrb[6].mxu0  ;;  %v1759_v53 = vpop.f32.mrb[6].mxu1 }
 0x105   : > { %v1399_v54 = vpack.c.bf16 %v1523_v52, %v1522_v44  ;;  %v623_v55 = vpop.f32.mrb[7].mxu0  ;;  %v1439_v56 = vpack.c.bf16 %v1759_v53, %v1755_v46  ;;  %v1763_v57 = vpop.f32.mrb[7].mxu1  ;;  %v1034_v2 = vmul.f32 %v1523_v52, %v1523_v52 }
 0x106   : > { %v1062_v58 = vadd.f32 %v1061_v51, %v1031_v50  ;;  %v1394_v59 = vpack.c.bf16 %v623_v55, %v620_v47  ;;  %v994_v60 = vadd.f32 %v993_v49, %v623_v55  ;;  %v1032_v61 = vmul.f32 %v623_v55, %v623_v55 }
 0x107   : > { %1463 = vst [vmem:[%s1741_s20 + $0x18] sm:$0xff] %v1399_v54   ;;  %1471 = vst [vmem:[%s1741_s20 + $0x58] sm:$0xff] %v1439_v56   ;;  %v1434_v62 = vpack.c.bf16 %v1763_v57, %v1757_v48 }
 0x108   : > { %1462 = vst [vmem:[%s1741_s20 + $0x10] sm:$0xff] %v1394_v59   ;;  %v995_v0 = vadd.f32 %v1522_v44, %v994_v60  ;;  %v1063_v1 = vadd.f32 %v1062_v58, %v1032_v61  ;;  %v1043_v61 = vmul.f32 %v1734_v27, %v1734_v27 }
 0x109   : > { %1470 = vst [vmem:[%s1741_s20 + $0x50] sm:$0xff] %v1434_v62  }
 0x10a   : > { %v1064_v3 = vadd.f32 %v1063_v1, %v1033_v63  ;;  %v1526_v4 = vpop.f32.mrb[8].mxu0  ;;  %v996_v5 = vadd.f32 %v1523_v52, %v995_v0  ;;  %v1771_v6 = vpop.f32.mrb[8].mxu1 }
 0x10b   : > { %v636_v7 = vpop.f32.mrb[9].mxu0  ;;  %v1773_v8 = vpop.f32.mrb[9].mxu1  ;;  %v1037_v23 = vmul.f32 %v1526_v4, %v1526_v4 }
 0x10c   : > { %v997_v9 = vadd.f32 %v996_v5, %v636_v7  ;;  %v1035_v10 = vmul.f32 %v636_v7, %v636_v7  ;;  %v1065_v11 = vadd.f32 %v1064_v3, %v1034_v2  ;;  %v1527_v12 = vpop.f32.mrb[10].mxu0  ;;  %v1775_v13 = vpop.f32.mrb[10].mxu1  ;;  %v1044_v2 = vmul.f32 %v1747_v34, %v1747_v34 }
 0x10d   : > { %v1409_v14 = vpack.c.bf16 %v1527_v12, %v1526_v4  ;;  %v639_v15 = vpop.f32.mrb[11].mxu0  ;;  %v1449_v16 = vpack.c.bf16 %v1775_v13, %v1771_v6  ;;  %v1779_v17 = vpop.f32.mrb[11].mxu1  ;;  %v1038_v28 = vmul.f32 %v1527_v12, %v1527_v12  ;;  %v1045_v3 = vmul.f32 %v1732_v25, %v1732_v25 }
 0x10e   : > { %v1066_v18 = vadd.f32 %v1065_v11, %v1035_v10  ;;  %v1404_v19 = vpack.c.bf16 %v639_v15, %v636_v7  ;;  %v998_v20 = vadd.f32 %v997_v9, %v639_v15  ;;  %v1036_v21 = vmul.f32 %v639_v15, %v639_v15 }
 0x10f   : > { %1465 = vst [vmem:[%s1741_s20 + $0x28] sm:$0xff] %v1409_v14   ;;  %1473 = vst [vmem:[%s1741_s20 + $0x68] sm:$0xff] %v1449_v16   ;;  %v1444_v22 = vpack.c.bf16 %v1779_v17, %v1773_v8  ;;  %v1046_v7 = vmul.f32 %v1743_v29, %v1743_v29  ;;  %v1048_v15 = vmul.f32 %v1763_v57, %v1763_v57 }
 0x110   : > { %1464 = vst [vmem:[%s1741_s20 + $0x20] sm:$0xff] %v1404_v19   ;;  %v999_v24 = vadd.f32 %v1526_v4, %v998_v20  ;;  %v1067_v26 = vadd.f32 %v1066_v18, %v1036_v21 }
 0x111   : > { %1472 = vst [vmem:[%s1741_s20 + $0x60] sm:$0xff] %v1444_v22  }
 0x112   : > { %v1068_v30 = vadd.f32 %v1067_v26, %v1037_v23  ;;  %v1530_v31 = vpop.f32.mrb[12].mxu0  ;;  %v1000_v32 = vadd.f32 %v1527_v12, %v999_v24  ;;  %v1787_v33 = vpop.f32.mrb[12].mxu1  ;;  %v1052_v24 = vmul.f32 %v1779_v17, %v1779_v17 }
 0x113   : > { %v652_v35 = vpop.f32.mrb[13].mxu0  ;;  %v716_v36 = vpop.f32.mrb[13].mxu1  ;;  %v1041_v54 = vmul.f32 %v1530_v31, %v1530_v31 }
 0x114   : > { %v1001_v37 = vadd.f32 %v1000_v32, %v652_v35  ;;  %v1039_v38 = vmul.f32 %v652_v35, %v652_v35  ;;  %v1069_v39 = vadd.f32 %v1068_v30, %v1038_v28  ;;  %v1531_v40 = vpop.f32.mrb[14].mxu0  ;;  %v1789_v41 = vpop.f32.mrb[14].mxu1 }
 0x115   : > { %v1419_v42 = vpack.c.bf16 %v1531_v40, %v1530_v31  ;;  %v655_v43 = vpop.f32.mrb[15].mxu0  ;;  %v1459_v44 = vpack.c.bf16 %v1789_v41, %v1787_v33  ;;  %v719_v45 = vpop.f32.mrb[15].mxu1  ;;  %v1042_v58 = vmul.f32 %v1531_v40, %v1531_v40 }
 0x116   : > { %v1070_v47 = vadd.f32 %v1069_v39, %v1039_v38  ;;  %v1414_v49 = vpack.c.bf16 %v655_v43, %v652_v35  ;;  %v1002_v50 = vadd.f32 %v1001_v37, %v655_v43  ;;  %v1040_v51 = vmul.f32 %v655_v43, %v655_v43 }
 0x117   : > { %1467 = vst [vmem:[%s1741_s20 + $0x38] sm:$0xff] %v1419_v42   ;;  %1475 = vst [vmem:[%s1741_s20 + $0x78] sm:$0xff] %v1459_v44   ;;  %v1454_v52 = vpack.c.bf16 %v719_v45, %v716_v36  ;;  %v1057_v39 = vmul.f32 %v1787_v33, %v1787_v33  ;;  %v1058_v42 = vmul.f32 %v1789_v41, %v1789_v41 }
 0x118   : > { %1466 = vst [vmem:[%s1741_s20 + $0x30] sm:$0xff] %v1414_v49   ;;  %v1003_v55 = vadd.f32 %v1530_v31, %v1002_v50  ;;  %v1071_v56 = vadd.f32 %v1070_v47, %v1040_v51  ;;  %v1055_v31 = vmul.f32 %v716_v36, %v716_v36 }
 0x119   : > { %1474 = vst [vmem:[%s1741_s20 + $0x70] sm:$0xff] %v1454_v52  }
 0x11a   : > { %v1072_v59 = vadd.f32 %v1071_v56, %v1041_v54  ;;  %v1004_v60 = vadd.f32 %v1531_v40, %v1003_v55 }
 0x11c   : > { %v1005_v62 = vadd.f32 %v1004_v60, %v1734_v27  ;;  %v1073_v63 = vadd.f32 %v1072_v59, %v1042_v58  ;;  %v1047_v27 = vmul.f32 %v1757_v48, %v1757_v48 }
 0x11e   : > { %v1074_v0 = vadd.f32 %v1073_v63, %v1043_v61  ;;  %v1006_v1 = vadd.f32 %v1005_v62, %v1747_v34 }
 0x120   : > { %v1007_v4 = vadd.f32 %v1732_v25, %v1006_v1  ;;  %v1075_v5 = vadd.f32 %v1074_v0, %v1044_v2  ;;  %v1049_v25 = vmul.f32 %v1755_v46, %v1755_v46 }
 0x122   : > { %v1076_v9 = vadd.f32 %v1075_v5, %v1045_v3  ;;  %v1008_v10 = vadd.f32 %v1743_v29, %v1007_v4  ;;  %v1050_v29 = vmul.f32 %v1759_v53, %v1759_v53 }
 0x124   : > { %v1009_v11 = vadd.f32 %v1008_v10, %v1757_v48  ;;  %v1077_v12 = vadd.f32 %v1076_v9, %v1046_v7  ;;  %v1051_v48 = vmul.f32 %v1773_v8, %v1773_v8 }
 0x126   : > { %v1078_v14 = vadd.f32 %v1077_v12, %v1047_v27  ;;  %v1010_v34 = vadd.f32 %v1009_v11, %v1763_v57 }
 0x128   : > { %v1011_v16 = vadd.f32 %v1755_v46, %v1010_v34  ;;  %v1079_v18 = vadd.f32 %v1078_v14, %v1048_v15  ;;  %v1053_v46 = vmul.f32 %v1771_v6, %v1771_v6 }
 0x12a   : > { %v1080_v19 = vadd.f32 %v1079_v18, %v1049_v25  ;;  %v1012_v20 = vadd.f32 %v1759_v53, %v1011_v16  ;;  %v1054_v53 = vmul.f32 %v1775_v13, %v1775_v13 }
 0x12c   : > { %v1013_v21 = vadd.f32 %v1012_v20, %v1773_v8  ;;  %v1081_v22 = vadd.f32 %v1080_v19, %v1050_v29 }
 0x12e   : > { %v1082_v23 = vadd.f32 %v1081_v22, %v1051_v48  ;;  %v1014_v57 = vadd.f32 %v1013_v21, %v1779_v17  ;;  %v1056_v17 = vmul.f32 %v719_v45, %v719_v45 }
 0x130   : > { %v1015_v26 = vadd.f32 %v1771_v6, %v1014_v57  ;;  %v1083_v28 = vadd.f32 %v1082_v23, %v1052_v24 }
 0x132   : > { %v1084_v30 = vadd.f32 %v1083_v28, %v1053_v46  ;;  %v1016_v8 = vadd.f32 %v1775_v13, %v1015_v26 }
 0x134   : > { %v1017_v32 = vadd.f32 %v1016_v8, %v716_v36  ;;  %v1085_v35 = vadd.f32 %v1084_v30, %v1054_v53 }
 0x136   : > { %v1086_v37 = vadd.f32 %v1085_v35, %v1055_v31  ;;  %v1018_v38 = vadd.f32 %v1017_v32, %v719_v45 }
 0x138   : > { %v1019_v40 = vadd.f32 %v1787_v33, %v1018_v38  ;;  %v1087_v6 = vadd.f32 %v1086_v37, %v1056_v17 }
 0x13a   : > { %v1020_v43 = vadd.f32 %v1789_v41, %v1019_v40  ;;  %v1088_v13 = vadd.f32 %v1087_v6, %v1057_v39 }
 0x13c   : > { %v1021_v44 = vrot.slane %v1020_v43, 4  ;;  %v1089_v47 = vadd.f32 %v1088_v13, %v1058_v42 }
 0x13e   : > { %v1022_v36 = vadd.f32 %v1021_v44, %v1020_v43  ;;  %v1090_v49 = vrot.slane %v1089_v47, 4 }
 0x140   : > { %v1023_v50 = vrot.slane %v1022_v36, 2  ;;  %v1091_v45 = vadd.f32 %v1090_v49, %v1089_v47 }
 0x142   : > { %v1024_v51 = vadd.f32 %v1023_v50, %v1022_v36  ;;  %v1092_v52 = vrot.slane %v1091_v45, 2 }
 0x144   : > { %v1025_v54 = vrot.slane %v1024_v51, 1  ;;  %v1093_v33 = vadd.f32 %v1092_v52, %v1091_v45 }
 0x146   : > { %v1026_v55 = vadd.f32 %v1025_v54, %v1024_v51  ;;  %v1094_v56 = vrot.slane %v1093_v33, 1 }
 0x148   : > { %v1095_v41 = vadd.f32 %v1094_v56, %v1093_v33  ;;  %1096 = vst [vmem:[%s301_s24] sm:$0xff] %v1026_v55 }
 0x14a   : > { %1097 = vst [vmem:[%s308_s27] sm:$0xff] %v1095_v41 }
 0x14b PF: > { %s15_s17 = sadd.s32 1, %s1634_s17   ;;  %s1861_s15 = smov %s1630_s16 }
 0x14c   : > { %p12_p6 = scmp.ge.s32.totalorder %s15_s17, 4   ;;  %s1862_s16 = smov %s1864_s18 }
 0x14e   :  { %14 = sbr.rel (!%p12_p6) target bundleno = 2 (0x2), region = 93 }

// kernel: bottleneck_forward.7
= control target key start
LH: loop header
LB: loop body
LE: loop exit
PB: predicated region body
PF: predicated region fallthrough
CT: control target
= control target key end

     0   :  { %s951_s21 = smov 0   ;;  %s1193_s0 = inlined_call_operand.vmem [shape: bf16[512,128], index: 0, kind: input, shape index: {}]   ;;  %s1194_s1 = inlined_call_operand.vmem [shape: bf16[512,128], index: 1, kind: input, shape index: {}]   ;;  %s1195_s2 = inlined_call_operand.vmem [shape: f32[1,128], index: 2, kind: input, shape index: {}]   ;;  %s1196_s3 = inlined_call_operand.vmem [shape: f32[1,128], index: 3, kind: input, shape index: {}]   ;;  %s1197_s4 = inlined_call_operand.vmem [shape: f32[1,128], index: 4, kind: input, shape index: {}]   ;;  %s1198_s5 = inlined_call_operand.vmem [shape: f32[1,128], index: 5, kind: input, shape index: {}]   ;;  %s1199_s6 = inlined_call_operand.vmem [shape: f32[512,128], index: 6, kind: output, shape index: {}]  }
   0x1 LB: > { %s725_s22 = sadd.s32 4294967295, %s914_s21   ;;  %p729_p0 = scmp.ge.s32.totalorder %s914_s21, 1  ;;  %s914_s21 = sphi %s951_s21, %s16_s21  }
   0x2   : > { %p224_p1 = scmp.lt.s32.totalorder %s914_s21, 3 }
   0x4   : > { %p225_p2 = pnand %p729_p0, %p224_p1 }
   0x5   : > { %s730_s23 = sshll.u32 (!%p225_p2), %s725_s22, 5  ;;  %v975_v0 = vld [vmem:[%s1195_s2] ss:$0 sm:$0xff] (!%p225_p2) }
   0x6   : > { %228 = sbr.rel (%p225_p2) target bundleno = 88 (0x58), region = 44  ;;  %p260_p3 = scmp.lt.s32.totalorder (!%p225_p2), %s730_s23, 63  ;;  %v980_v1 = vld [vmem:[%s1197_s4] ss:$0 sm:$0xff] (!%p225_p2) }
   0x7   : > { %v989_v10 = vld [vmem:[%s1196_s3] ss:$0 sm:$0xff] (!%p225_p2) }
   0x8   : > { %v994_v11 = vld [vmem:[%s1198_s5] ss:$0 sm:$0xff] (!%p225_p2) }
   0xd   : > { %s1201_s23 = smov (!%p260_p3, %s730_s23), 63 }
   0xe   : > { %s731_s24 = sshll.u32 %s1201_s23, 2  ;;  %s735_s15 = sshll.u32 %s1201_s23, 3 }
   0xf   : > { %s965_s27 = scalar_lea.vmem %s1193_s0, %s731_s24  ;;  %s970_s30 = scalar_lea.vmem %s1194_s1, %s731_s24 }
  0x10   : > { %v743_v2 = vld [vmem:[%s965_s27] sm:$0xff]   ;;  %v870_v4 = vld [vmem:[%s965_s27 + $0x8] sm:$0xff]   ;;  %v871_v24 = vld [vmem:[%s965_s27 + $0x10] sm:$0xff]   ;;  %s1018_s18 = scalar_lea.vmem %s1199_s6, %s735_s15 }
  0x11   : > { %v807_v3 = vld [vmem:[%s970_s30] sm:$0xff]   ;;  %v744_v5 = vunpack.c.l.bf16 %v743_v2  ;;  %v745_v7 = vunpack.c.h.bf16 %v743_v2  ;;  %v885_v9 = vld [vmem:[%s970_s30 + $0x8] sm:$0xff]   ;;  %v748_v12 = vunpack.c.l.bf16 %v870_v4  ;;  %v749_v14 = vunpack.c.h.bf16 %v870_v4  ;;  %v886_v25 = vld [vmem:[%s970_s30 + $0x10] sm:$0xff]  }
  0x12   : > { %v808_v6 = vunpack.c.l.bf16 %v807_v3  ;;  %v809_v8 = vunpack.c.h.bf16 %v807_v3  ;;  %v812_v13 = vunpack.c.l.bf16 %v885_v9  ;;  %v813_v15 = vunpack.c.h.bf16 %v885_v9  ;;  %v872_v42 = vld [vmem:[%s965_s27 + $0x18] sm:$0xff]   ;;  %v873_v52 = vld [vmem:[%s965_s27 + $0x20] sm:$0xff]  }
  0x13   : > { %v348_v16 = vmul.f32 %v744_v5, %v975_v0  ;;  %v349_v18 = vmul.f32 %v745_v7, %v975_v0  ;;  %v350_v20 = vmul.f32 %v748_v12, %v975_v0  ;;  %v351_v22 = vmul.f32 %v749_v14, %v975_v0  ;;  %v887_v43 = vld [vmem:[%s970_s30 + $0x18] sm:$0xff]   ;;  %v888_v57 = vld [vmem:[%s970_s30 + $0x20] sm:$0xff]   ;;  %v874_v14 = vld [vmem:[%s965_s27 + $0x28] sm:$0xff]  }
  0x14   : > { %v490_v17 = vmul.f32 %v808_v6, %v980_v1  ;;  %v491_v19 = vmul.f32 %v809_v8, %v980_v1  ;;  %v492_v21 = vmul.f32 %v812_v13, %v980_v1  ;;  %v493_v23 = vmul.f32 %v813_v15, %v980_v1  ;;  %v889_v15 = vld [vmem:[%s970_s30 + $0x28] sm:$0xff]  }
  0x15   : > { %v387_v26 = vadd.f32 %v989_v10, %v348_v16  ;;  %v388_v28 = vadd.f32 %v989_v10, %v349_v18  ;;  %v389_v30 = vadd.f32 %v989_v10, %v350_v20  ;;  %v390_v32 = vadd.f32 %v989_v10, %v351_v22 }
  0x16   : > { %v529_v27 = vadd.f32 %v994_v11, %v490_v17  ;;  %v530_v29 = vadd.f32 %v994_v11, %v491_v19  ;;  %v531_v31 = vadd.f32 %v994_v11, %v492_v21  ;;  %v532_v33 = vadd.f32 %v994_v11, %v493_v23 }
  0x17   : > { %v752_v36 = vunpack.c.l.bf16 %v871_v24  ;;  %v816_v37 = vunpack.c.l.bf16 %v886_v25  ;;  %v753_v40 = vunpack.c.h.bf16 %v871_v24  ;;  %v817_v41 = vunpack.c.h.bf16 %v886_v25 }
  0x18   : > { %v561_v34 = vadd.f32 %v529_v27, %v387_v26  ;;  %v562_v35 = vadd.f32 %v530_v29, %v388_v28  ;;  %v563_v38 = vadd.f32 %v531_v31, %v389_v30  ;;  %v564_v39 = vadd.f32 %v532_v33, %v390_v32  ;;  %v875_v32 = vld [vmem:[%s965_s27 + $0x30] sm:$0xff]  }
  0x19   : > { %v352_v46 = vmul.f32 %v752_v36, %v975_v0  ;;  %v494_v47 = vmul.f32 %v816_v37, %v980_v1  ;;  %v353_v50 = vmul.f32 %v753_v40, %v975_v0  ;;  %v495_v51 = vmul.f32 %v817_v41, %v980_v1  ;;  %v890_v37 = vld [vmem:[%s970_s30 + $0x30] sm:$0xff]  }
  0x1a   : > { %v593_v44 = vmax.f32 %v561_v34, 0.0  ;;  %v594_v45 = vmax.f32 %v562_v35, 0.0  ;;  %v595_v48 = vmax.f32 %v563_v38, 0.0  ;;  %v596_v49 = vmax.f32 %v564_v39, 0.0 }
  0x1b   : > { %v391_v53 = vadd.f32 %v989_v10, %v352_v46  ;;  %v533_v54 = vadd.f32 %v994_v11, %v494_v47  ;;  %v756_v55 = vunpack.c.l.bf16 %v872_v42  ;;  %v820_v56 = vunpack.c.l.bf16 %v887_v43  ;;  %v876_v46 = vld [vmem:[%s965_s27 + $0x38] sm:$0xff]  }
  0x1c   : > { %625 = vst [vmem:[%s1018_s18] sm:$0xff] %v593_v44  ;;  %626 = vst [vmem:[%s1018_s18 + $0x8] sm:$0xff] %v594_v45  ;;  %v392_v58 = vadd.f32 %v989_v10, %v353_v50  ;;  %v534_v59 = vadd.f32 %v994_v11, %v495_v51  ;;  %v757_v60 = vunpack.c.h.bf16 %v872_v42  ;;  %v821_v61 = vunpack.c.h.bf16 %v887_v43 }
  0x1d   : > { %627 = vst [vmem:[%s1018_s18 + $0x10] sm:$0xff] %v595_v48  ;;  %628 = vst [vmem:[%s1018_s18 + $0x18] sm:$0xff] %v596_v49  ;;  %v565_v62 = vadd.f32 %v533_v54, %v391_v53  ;;  %v354_v63 = vmul.f32 %v756_v55, %v975_v0  ;;  %v496_v2 = vmul.f32 %v820_v56, %v980_v1  ;;  %v760_v3 = vunpack.c.l.bf16 %v873_v52  ;;  %v891_v55 = vld [vmem:[%s970_s30 + $0x38] sm:$0xff]  }
  0x1e   : > { %v566_v4 = vadd.f32 %v534_v59, %v392_v58  ;;  %v355_v5 = vmul.f32 %v757_v60, %v975_v0  ;;  %v497_v6 = vmul.f32 %v821_v61, %v980_v1  ;;  %v824_v7 = vunpack.c.l.bf16 %v888_v57 }
  0x1f   : > { %v597_v8 = vmax.f32 %v565_v62, 0.0  ;;  %v393_v9 = vadd.f32 %v989_v10, %v354_v63  ;;  %v535_v12 = vadd.f32 %v994_v11, %v496_v2  ;;  %v356_v13 = vmul.f32 %v760_v3, %v975_v0 }
  0x20   : > { %v598_v16 = vmax.f32 %v566_v4, 0.0  ;;  %v394_v17 = vadd.f32 %v989_v10, %v355_v5  ;;  %v536_v18 = vadd.f32 %v994_v11, %v497_v6  ;;  %v498_v19 = vmul.f32 %v824_v7, %v980_v1  ;;  %v877_v6 = vld [vmem:[%s965_s27 + $0x40] sm:$0xff]  }
  0x21   : > { %629 = vst [vmem:[%s1018_s18 + $0x20] sm:$0xff] %v597_v8  ;;  %v567_v20 = vadd.f32 %v535_v12, %v393_v9  ;;  %v395_v21 = vadd.f32 %v989_v10, %v356_v13  ;;  %v761_v22 = vunpack.c.h.bf16 %v873_v52  ;;  %v825_v23 = vunpack.c.h.bf16 %v888_v57  ;;  %v892_v13 = vld [vmem:[%s970_s30 + $0x40] sm:$0xff]  }
  0x22   : > { %630 = vst [vmem:[%s1018_s18 + $0x28] sm:$0xff] %v598_v16  ;;  %v568_v24 = vadd.f32 %v536_v18, %v394_v17  ;;  %v537_v25 = vadd.f32 %v994_v11, %v498_v19  ;;  %v764_v26 = vunpack.c.l.bf16 %v874_v14  ;;  %v828_v27 = vunpack.c.l.bf16 %v889_v15 }
  0x23   : > { %v599_v28 = vmax.f32 %v567_v20, 0.0  ;;  %v357_v29 = vmul.f32 %v761_v22, %v975_v0  ;;  %v499_v30 = vmul.f32 %v825_v23, %v980_v1  ;;  %v765_v31 = vunpack.c.h.bf16 %v874_v14 }
  0x24   : > { %v600_v33 = vmax.f32 %v568_v24, 0.0  ;;  %v569_v34 = vadd.f32 %v537_v25, %v395_v21  ;;  %v358_v35 = vmul.f32 %v764_v26, %v975_v0  ;;  %v500_v36 = vmul.f32 %v828_v27, %v980_v1  ;;  %v878_v26 = vld [vmem:[%s965_s27 + $0x48] sm:$0xff]  }
  0x25   : > { %631 = vst [vmem:[%s1018_s18 + $0x30] sm:$0xff] %v599_v28  ;;  %v396_v38 = vadd.f32 %v989_v10, %v357_v29  ;;  %v538_v39 = vadd.f32 %v994_v11, %v499_v30  ;;  %v359_v40 = vmul.f32 %v765_v31, %v975_v0  ;;  %v829_v41 = vunpack.c.h.bf16 %v889_v15  ;;  %v893_v27 = vld [vmem:[%s970_s30 + $0x48] sm:$0xff]  }
  0x26   : > { %632 = vst [vmem:[%s1018_s18 + $0x38] sm:$0xff] %v600_v33  ;;  %v601_v42 = vmax.f32 %v569_v34, 0.0  ;;  %v397_v43 = vadd.f32 %v989_v10, %v358_v35  ;;  %v539_v44 = vadd.f32 %v994_v11, %v500_v36  ;;  %v768_v45 = vunpack.c.l.bf16 %v875_v32 }
  0x27   : > { %v570_v47 = vadd.f32 %v538_v39, %v396_v38  ;;  %v398_v48 = vadd.f32 %v989_v10, %v359_v40  ;;  %v501_v49 = vmul.f32 %v829_v41, %v980_v1  ;;  %v832_v50 = vunpack.c.l.bf16 %v890_v37  ;;  %v879_v40 = vld [vmem:[%s965_s27 + $0x50] sm:$0xff]  }
  0x28   : > { %633 = vst [vmem:[%s1018_s18 + $0x40] sm:$0xff] %v601_v42  ;;  %v571_v51 = vadd.f32 %v539_v44, %v397_v43  ;;  %v360_v52 = vmul.f32 %v768_v45, %v975_v0  ;;  %v769_v53 = vunpack.c.h.bf16 %v875_v32  ;;  %v833_v54 = vunpack.c.h.bf16 %v890_v37  ;;  %v894_v45 = vld [vmem:[%s970_s30 + $0x50] sm:$0xff]  }
  0x29   : > { %v602_v56 = vmax.f32 %v570_v47, 0.0  ;;  %v540_v57 = vadd.f32 %v994_v11, %v501_v49  ;;  %v502_v58 = vmul.f32 %v832_v50, %v980_v1  ;;  %v772_v59 = vunpack.c.l.bf16 %v876_v46 }
  0x2a   : > { %v603_v60 = vmax.f32 %v571_v51, 0.0  ;;  %v399_v61 = vadd.f32 %v989_v10, %v360_v52  ;;  %v361_v62 = vmul.f32 %v769_v53, %v975_v0  ;;  %v503_v63 = vmul.f32 %v833_v54, %v980_v1 }
  0x2b   : > { %634 = vst [vmem:[%s1018_s18 + $0x48] sm:$0xff] %v602_v56  ;;  %v572_v2 = vadd.f32 %v540_v57, %v398_v48  ;;  %v541_v3 = vadd.f32 %v994_v11, %v502_v58  ;;  %v362_v4 = vmul.f32 %v772_v59, %v975_v0  ;;  %v836_v5 = vunpack.c.l.bf16 %v891_v55 }
  0x2c   : > { %635 = vst [vmem:[%s1018_s18 + $0x50] sm:$0xff] %v603_v60  ;;  %v400_v7 = vadd.f32 %v989_v10, %v361_v62  ;;  %v542_v8 = vadd.f32 %v994_v11, %v503_v63  ;;  %v773_v9 = vunpack.c.h.bf16 %v876_v46  ;;  %v837_v12 = vunpack.c.h.bf16 %v891_v55  ;;  %v880_v62 = vld [vmem:[%s965_s27 + $0x58] sm:$0xff]  }
  0x2d   : > { %v604_v14 = vmax.f32 %v572_v2, 0.0  ;;  %v573_v15 = vadd.f32 %v541_v3, %v399_v61  ;;  %v401_v16 = vadd.f32 %v989_v10, %v362_v4  ;;  %v504_v17 = vmul.f32 %v836_v5, %v980_v1  ;;  %v895_v5 = vld [vmem:[%s970_s30 + $0x58] sm:$0xff]  }
  0x2e   : > { %v574_v18 = vadd.f32 %v542_v8, %v400_v7  ;;  %v363_v19 = vmul.f32 %v773_v9, %v975_v0  ;;  %v505_v20 = vmul.f32 %v837_v12, %v980_v1  ;;  %v776_v21 = vunpack.c.l.bf16 %v877_v6 }
  0x2f   : > { %636 = vst [vmem:[%s1018_s18 + $0x58] sm:$0xff] %v604_v14  ;;  %v605_v22 = vmax.f32 %v573_v15, 0.0  ;;  %v543_v23 = vadd.f32 %v994_v11, %v504_v17  ;;  %v840_v24 = vunpack.c.l.bf16 %v892_v13  ;;  %v777_v25 = vunpack.c.h.bf16 %v877_v6 }
  0x30   : > { %v606_v28 = vmax.f32 %v574_v18, 0.0  ;;  %v402_v29 = vadd.f32 %v989_v10, %v363_v19  ;;  %v544_v30 = vadd.f32 %v994_v11, %v505_v20  ;;  %v364_v31 = vmul.f32 %v776_v21, %v975_v0  ;;  %v881_v20 = vld [vmem:[%s965_s27 + $0x60] sm:$0xff]  }
  0x31   : > { %637 = vst [vmem:[%s1018_s18 + $0x60] sm:$0xff] %v605_v22  ;;  %v575_v32 = vadd.f32 %v543_v23, %v401_v16  ;;  %v506_v33 = vmul.f32 %v840_v24, %v980_v1  ;;  %v365_v34 = vmul.f32 %v777_v25, %v975_v0  ;;  %v841_v35 = vunpack.c.h.bf16 %v892_v13  ;;  %v896_v25 = vld [vmem:[%s970_s30 + $0x60] sm:$0xff]  }
  0x32   : > { %638 = vst [vmem:[%s1018_s18 + $0x68] sm:$0xff] %v606_v28  ;;  %v576_v36 = vadd.f32 %v544_v30, %v402_v29  ;;  %v403_v37 = vadd.f32 %v989_v10, %v364_v31  ;;  %v780_v38 = vunpack.c.l.bf16 %v878_v26  ;;  %v844_v39 = vunpack.c.l.bf16 %v893_v27 }
  0x33   : > { %v607_v41 = vmax.f32 %v575_v32, 0.0  ;;  %v545_v42 = vadd.f32 %v994_v11, %v506_v33  ;;  %v404_v43 = vadd.f32 %v989_v10, %v365_v34  ;;  %v507_v44 = vmul.f32 %v841_v35, %v980_v1  ;;  %v882_v34 = vld [vmem:[%s965_s27 + $0x68] sm:$0xff]  }
  0x34   : > { %v608_v46 = vmax.f32 %v576_v36, 0.0  ;;  %v366_v47 = vmul.f32 %v780_v38, %v975_v0  ;;  %v508_v48 = vmul.f32 %v844_v39, %v980_v1  ;;  %v781_v49 = vunpack.c.h.bf16 %v878_v26 }
  0x35   : > { %639 = vst [vmem:[%s1018_s18 + $0x70] sm:$0xff] %v607_v41  ;;  %v577_v50 = vadd.f32 %v545_v42, %v403_v37  ;;  %v546_v51 = vadd.f32 %v994_v11, %v507_v44  ;;  %v845_v52 = vunpack.c.h.bf16 %v893_v27  ;;  %v784_v53 = vunpack.c.l.bf16 %v879_v40 }
  0x36   : > { %640 = vst [vmem:[%s1018_s18 + $0x78] sm:$0xff] %v608_v46  ;;  %v405_v54 = vadd.f32 %v989_v10, %v366_v47  ;;  %v547_v55 = vadd.f32 %v994_v11, %v508_v48  ;;  %v367_v56 = vmul.f32 %v781_v49, %v975_v0  ;;  %v848_v57 = vunpack.c.l.bf16 %v894_v45 }
  0x37   : > { %v609_v58 = vmax.f32 %v577_v50, 0.0  ;;  %v578_v59 = vadd.f32 %v546_v51, %v404_v43  ;;  %v509_v60 = vmul.f32 %v845_v52, %v980_v1  ;;  %v368_v61 = vmul.f32 %v784_v53, %v975_v0  ;;  %v897_v43 = vld [vmem:[%s970_s30 + $0x68] sm:$0xff]  }
  0x38   : > { %v579_v63 = vadd.f32 %v547_v55, %v405_v54  ;;  %v406_v2 = vadd.f32 %v989_v10, %v367_v56  ;;  %v510_v3 = vmul.f32 %v848_v57, %v980_v1  ;;  %v785_v4 = vunpack.c.h.bf16 %v879_v40  ;;  %v883_v56 = vld [vmem:[%s965_s27 + $0x70] sm:$0xff]  }
  0x39   : > { %641 = vst [vmem:[%s1018_s18 + $0x80] sm:$0xff] %v609_v58  ;;  %v610_v6 = vmax.f32 %v578_v59, 0.0  ;;  %v548_v7 = vadd.f32 %v994_v11, %v509_v60  ;;  %v407_v8 = vadd.f32 %v989_v10, %v368_v61  ;;  %v849_v9 = vunpack.c.h.bf16 %v894_v45  ;;  %v898_v57 = vld [vmem:[%s970_s30 + $0x70] sm:$0xff]  }
  0x3a   : > { %v611_v12 = vmax.f32 %v579_v63, 0.0  ;;  %v549_v13 = vadd.f32 %v994_v11, %v510_v3  ;;  %v369_v14 = vmul.f32 %v785_v4, %v975_v0  ;;  %v788_v15 = vunpack.c.l.bf16 %v880_v62 }
  0x3b   : > { %642 = vst [vmem:[%s1018_s18 + $0x88] sm:$0xff] %v610_v6  ;;  %v580_v16 = vadd.f32 %v548_v7, %v406_v2  ;;  %v511_v17 = vmul.f32 %v849_v9, %v980_v1  ;;  %v852_v18 = vunpack.c.l.bf16 %v895_v5  ;;  %v789_v19 = vunpack.c.h.bf16 %v880_v62 }
  0x3c   : > { %643 = vst [vmem:[%s1018_s18 + $0x90] sm:$0xff] %v611_v12  ;;  %v581_v21 = vadd.f32 %v549_v13, %v407_v8  ;;  %v408_v22 = vadd.f32 %v989_v10, %v369_v14  ;;  %v370_v23 = vmul.f32 %v788_v15, %v975_v0  ;;  %v853_v24 = vunpack.c.h.bf16 %v895_v5  ;;  %v884_v14 = vld [vmem:[%s965_s27 + $0x78] sm:$0xff]  }
  0x3d   : > { %v612_v26 = vmax.f32 %v580_v16, 0.0  ;;  %v550_v27 = vadd.f32 %v994_v11, %v511_v17  ;;  %v512_v28 = vmul.f32 %v852_v18, %v980_v1  ;;  %v371_v29 = vmul.f32 %v789_v19, %v975_v0  ;;  %v899_v15 = vld [vmem:[%s970_s30 + $0x78] sm:$0xff]  }
  0x3e   : > { %v613_v30 = vmax.f32 %v581_v21, 0.0  ;;  %v409_v31 = vadd.f32 %v989_v10, %v370_v23  ;;  %v513_v32 = vmul.f32 %v853_v24, %v980_v1  ;;  %v792_v33 = vunpack.c.l.bf16 %v881_v20 }
  0x3f   : > { %644 = vst [vmem:[%s1018_s18 + $0x98] sm:$0xff] %v612_v26  ;;  %v582_v35 = vadd.f32 %v550_v27, %v408_v22  ;;  %v551_v36 = vadd.f32 %v994_v11, %v512_v28  ;;  %v410_v37 = vadd.f32 %v989_v10, %v371_v29  ;;  %v856_v38 = vunpack.c.l.bf16 %v896_v25 }
  0x40   : > { %645 = vst [vmem:[%s1018_s18 + $0xa0] sm:$0xff] %v613_v30  ;;  %v552_v39 = vadd.f32 %v994_v11, %v513_v32  ;;  %v372_v40 = vmul.f32 %v792_v33, %v975_v0  ;;  %v793_v41 = vunpack.c.h.bf16 %v881_v20  ;;  %v857_v42 = vunpack.c.h.bf16 %v896_v25 }
  0x41   : > { %v614_v44 = vmax.f32 %v582_v35, 0.0  ;;  %v583_v45 = vadd.f32 %v551_v36, %v409_v31  ;;  %v514_v46 = vmul.f32 %v856_v38, %v980_v1  ;;  %v796_v47 = vunpack.c.l.bf16 %v882_v34 }
  0x42   : > { %v584_v48 = vadd.f32 %v552_v39, %v410_v37  ;;  %v411_v49 = vadd.f32 %v989_v10, %v372_v40  ;;  %v373_v50 = vmul.f32 %v793_v41, %v975_v0  ;;  %v515_v51 = vmul.f32 %v857_v42, %v980_v1 }
  0x43   : > { %646 = vst [vmem:[%s1018_s18 + $0xa8] sm:$0xff] %v614_v44  ;;  %v615_v52 = vmax.f32 %v583_v45, 0.0  ;;  %v553_v53 = vadd.f32 %v994_v11, %v514_v46  ;;  %v374_v54 = vmul.f32 %v796_v47, %v975_v0  ;;  %v860_v55 = vunpack.c.l.bf16 %v897_v43 }
  0x44   : > { %v616_v58 = vmax.f32 %v584_v48, 0.0  ;;  %v412_v59 = vadd.f32 %v989_v10, %v373_v50  ;;  %v554_v60 = vadd.f32 %v994_v11, %v515_v51  ;;  %v797_v61 = vunpack.c.h.bf16 %v882_v34 }
  0x45   : > { %647 = vst [vmem:[%s1018_s18 + $0xb0] sm:$0xff] %v615_v52  ;;  %v585_v62 = vadd.f32 %v553_v53, %v411_v49  ;;  %v413_v63 = vadd.f32 %v989_v10, %v374_v54  ;;  %v516_v2 = vmul.f32 %v860_v55, %v980_v1  ;;  %v861_v3 = vunpack.c.h.bf16 %v897_v43 }
  0x46   : > { %648 = vst [vmem:[%s1018_s18 + $0xb8] sm:$0xff] %v616_v58  ;;  %v586_v4 = vadd.f32 %v554_v60, %v412_v59  ;;  %v375_v5 = vmul.f32 %v797_v61, %v975_v0  ;;  %v800_v6 = vunpack.c.l.bf16 %v883_v56  ;;  %v864_v7 = vunpack.c.l.bf16 %v898_v57 }
  0x47   : > { %v617_v8 = vmax.f32 %v585_v62, 0.0  ;;  %v555_v9 = vadd.f32 %v994_v11, %v516_v2  ;;  %v517_v12 = vmul.f32 %v861_v3, %v980_v1  ;;  %v801_v13 = vunpack.c.h.bf16 %v883_v56 }
  0x48   : > { %v618_v16 = vmax.f32 %v586_v4, 0.0  ;;  %v414_v17 = vadd.f32 %v989_v10, %v375_v5  ;;  %v376_v18 = vmul.f32 %v800_v6, %v975_v0  ;;  %v518_v19 = vmul.f32 %v864_v7, %v980_v1 }
  0x49   : > { %649 = vst [vmem:[%s1018_s18 + $0xc0] sm:$0xff] %v617_v8  ;;  %v587_v20 = vadd.f32 %v555_v9, %v413_v63  ;;  %v556_v21 = vadd.f32 %v994_v11, %v517_v12  ;;  %v377_v22 = vmul.f32 %v801_v13, %v975_v0  ;;  %v865_v23 = vunpack.c.h.bf16 %v898_v57 }
  0x4a   : > { %650 = vst [vmem:[%s1018_s18 + $0xc8] sm:$0xff] %v618_v16  ;;  %v415_v24 = vadd.f32 %v989_v10, %v376_v18  ;;  %v557_v25 = vadd.f32 %v994_v11, %v518_v19  ;;  %v804_v26 = vunpack.c.l.bf16 %v884_v14  ;;  %v868_v27 = vunpack.c.l.bf16 %v899_v15 }
  0x4b   : > { %v619_v28 = vmax.f32 %v587_v20, 0.0  ;;  %v588_v29 = vadd.f32 %v556_v21, %v414_v17  ;;  %v416_v30 = vadd.f32 %v989_v10, %v377_v22  ;;  %v519_v31 = vmul.f32 %v865_v23, %v980_v1 }
  0x4c   : > { %v589_v32 = vadd.f32 %v557_v25, %v415_v24  ;;  %v378_v33 = vmul.f32 %v804_v26, %v975_v0  ;;  %v520_v34 = vmul.f32 %v868_v27, %v980_v1  ;;  %v805_v35 = vunpack.c.h.bf16 %v884_v14 }
  0x4d   : > { %651 = vst [vmem:[%s1018_s18 + $0xd0] sm:$0xff] %v619_v28  ;;  %v620_v36 = vmax.f32 %v588_v29, 0.0  ;;  %v558_v37 = vadd.f32 %v994_v11, %v519_v31  ;;  %v869_v38 = vunpack.c.h.bf16 %v899_v15 }
  0x4e   : > { %v621_v39 = vmax.f32 %v589_v32, 0.0  ;;  %v417_v40 = vadd.f32 %v989_v10, %v378_v33  ;;  %v559_v41 = vadd.f32 %v994_v11, %v520_v34  ;;  %v379_v42 = vmul.f32 %v805_v35, %v975_v0 }
  0x4f   : > { %652 = vst [vmem:[%s1018_s18 + $0xd8] sm:$0xff] %v620_v36  ;;  %v590_v43 = vadd.f32 %v558_v37, %v416_v30  ;;  %v521_v44 = vmul.f32 %v869_v38, %v980_v1 }
  0x50   : > { %653 = vst [vmem:[%s1018_s18 + $0xe0] sm:$0xff] %v621_v39  ;;  %v591_v45 = vadd.f32 %v559_v41, %v417_v40  ;;  %v418_v46 = vadd.f32 %v989_v10, %v379_v42 }
  0x51   : > { %v622_v47 = vmax.f32 %v590_v43, 0.0  ;;  %v560_v48 = vadd.f32 %v994_v11, %v521_v44 }
  0x52   : > { %v623_v49 = vmax.f32 %v591_v45, 0.0 }
  0x53   : > { %654 = vst [vmem:[%s1018_s18 + $0xe8] sm:$0xff] %v622_v47  ;;  %v592_v50 = vadd.f32 %v560_v48, %v418_v46 }
  0x54   : > { %655 = vst [vmem:[%s1018_s18 + $0xf0] sm:$0xff] %v623_v49 }
  0x55   : > { %v624_v51 = vmax.f32 %v592_v50, 0.0 }
  0x57   : > { %656 = vst [vmem:[%s1018_s18 + $0xf8] sm:$0xff] %v624_v51 }
  0x58 PF: > { %s16_s21 = sadd.s32 1, %s914_s21  }
  0x59   : > { %p13_p4 = scmp.ge.s32.totalorder %s16_s21, 4  }
  0x5b   :  { %15 = sbr.rel (!%p13_p4) target bundleno = 1 (0x1), region = 77 }

// kernel: bottleneck_forward.6
= control target key start
LH: loop header
LB: loop body
LE: loop exit
PB: predicated region body
PF: predicated region fallthrough
CT: control target
= control target key end

     0   :  { %s1890_s21 = smov 0   ;;  %s1892_s22 = smov 0   ;;  %s2177_s0 = inlined_call_operand.vmem [shape: bf16[512,128], index: 0, kind: input, shape index: {}]   ;;  %s2178_s1 = inlined_call_operand.vmem [shape: bf16[128,128], index: 1, kind: input, shape index: {}]   ;;  %s2179_s2 = inlined_call_operand.vmem [shape: f32[1,128], index: 2, kind: input, shape index: {}]   ;;  %s2180_s3 = inlined_call_operand.vmem [shape: f32[1,128], index: 3, kind: input, shape index: {}]   ;;  %s2181_s4 = inlined_call_operand.vmem [shape: bf16[512,128], index: 4, kind: output, shape index: {0}]   ;;  %s2182_s5 = inlined_call_operand.vmem [shape: f32[2,8,128], index: 5, kind: output, shape index: {1}]   ;;  %s2183_s6 = inlined_call_operand.vmem [shape: f32[2,8,128], index: 6, kind: output, shape index: {2}]  }
   0x1   :  { %s1894_s23 = smov 0  }
   0x2 LB: > { %s36_s24 = sadd.s32 1, %s1849_s22  ;;  %p1454_p0 = scmp.ge.s32.totalorder %s1853_s23, 1  ;;  %s1853_s23 = sphi %s1894_s23, %s17_s23   ;;  %s1849_s22 = sphi %s1892_s22, %s2185_s22   ;;  %s1845_s21 = sphi %s1890_s21, %s2184_s21  }
   0x3   : > { %p38_p1 = scmp.ge.s32.totalorder %s36_s24, 2  ;;  %p280_p2 = scmp.lt.s32.totalorder %s1853_s23, 3 }
   0x5   : > { %s2187_s24 = smov (%p38_p1, %s36_s24), 0  ;;  %p281_p3 = pnand %p1454_p0, %p280_p2 }
   0x6   : > { %v1823_v0 = vld [vmem:[%s2178_s1] sm:$0xff] (!%p281_p3)   ;;  %s1455_s27 = sshll.u32 (!%p281_p3), %s1845_s21, 5  ;;  %v1824_v1 = vld [vmem:[%s2178_s1 + $0x8] sm:$0xff] (!%p281_p3)   ;;  %v1825_v2 = vld [vmem:[%s2178_s1 + $0x10] sm:$0xff] (!%p281_p3)   ;;  %p377_p5 = scmp.lt.s32.totalorder (!%p281_p3), %s1845_s21, 1 }
   0x7   : > { %284 = sbr.rel (%p281_p3) target bundleno = 331 (0x14b), region = 36  ;;  %p345_p4 = scmp.lt.s32.totalorder (!%p281_p3), %s1455_s27, 63  ;;  %1735 = vmatprep.subr.bf16.mxu0 (!%p281_p3), %v1823_v0  ;;  %1783 = vmatprep.subr.bf16.mxu1 (!%p281_p3), %v1823_v0  ;;  %v1826_v3 = vld [vmem:[%s2178_s1 + $0x18] sm:$0xff] (!%p281_p3)   ;;  %v1937_v5 = vld [vmem:[%s2179_s2] ss:$0 sm:$0xff] (!%p281_p3)  ;;  %v1828_v34 = vld [vmem:[%s2178_s1 + $0x28] sm:$0xff] (!%p281_p3)  }
   0x8   : > { %1736 = vmatpush3.bf16.msra.mxu0 (!%p281_p3), %v1823_v0  ;;  %1791 = vmatpush3.bf16.msra.mxu1 (!%p281_p3), %v1823_v0  ;;  %v1945_v11 = vld [vmem:[%s2180_s3] ss:$0 sm:$0xff] (!%p281_p3)  ;;  %v1829_v49 = vld [vmem:[%s2178_s1 + $0x30] sm:$0xff] (!%p281_p3)   ;;  %v1830_v63 = vld [vmem:[%s2178_s1 + $0x38] sm:$0xff] (!%p281_p3)  }
   0x9   : > { %1737 = vmatprep.subr.bf16.mxu0 (!%p281_p3), %v1824_v1  ;;  %1784 = vmatprep.subr.bf16.mxu1 (!%p281_p3), %v1824_v1  ;;  %v1827_v20 = vld [vmem:[%s2178_s1 + $0x20] sm:$0xff] (!%p281_p3)  }
   0xc   : > { %1738 = vmatpush3.bf16.msra.mxu0 (!%p281_p3), %v1824_v1  ;;  %1792 = vmatpush3.bf16.msra.mxu1 (!%p281_p3), %v1824_v1 }
   0xd   : > { %1739 = vmatprep.subr.bf16.mxu0 (!%p281_p3), %v1825_v2  ;;  %1785 = vmatprep.subr.bf16.mxu1 (!%p281_p3), %v1825_v2 }
   0xe   : > { %s2189_s27 = smov (!%p345_p4, %s1455_s27), 63  ;;  %s2191_s21 = smov (!%p377_p5, %s1845_s21), 1 }
   0xf   : > { %s1456_s8 = sshll.u32 %s2189_s27, 2  ;;  %s1459_s27 = sshll.u32 %s2191_s21, 3 }
  0x10   : > { %s1928_s11 = scalar_lea.vmem %s2177_s0, %s1456_s8  ;;  %1740 = vmatpush3.bf16.msra.mxu0 %v1825_v2  ;;  %1793 = vmatpush3.bf16.msra.mxu1 %v1825_v2  ;;  %s2070_s10 = scalar_lea.vmem %s2181_s4, %s1456_s8 }
  0x11   : > { %v1538_v4 = vld [vmem:[%s1928_s11] sm:$0xff]   ;;  %v1681_v8 = vld [vmem:[%s1928_s11 + $0x8] sm:$0xff]   ;;  %v1682_v9 = vld [vmem:[%s1928_s11 + $0x10] sm:$0xff]   ;;  %1741 = vmatprep.subr.bf16.mxu0 %v1826_v3  ;;  %1786 = vmatprep.subr.bf16.mxu1 %v1826_v3  ;;  %s383_s12 = scalar_lea.vmem %s2182_s5, %s1459_s27  ;;  %s390_s15 = scalar_lea.vmem %s2183_s6, %s1459_s27 }
  0x12   : > { %v1539_v6 = vunpack.c.l.bf16 %v1538_v4  ;;  %v1540_v7 = vunpack.c.h.bf16 %v1538_v4  ;;  %v1683_v10 = vld [vmem:[%s1928_s11 + $0x18] sm:$0xff]   ;;  %v1543_v12 = vunpack.c.l.bf16 %v1681_v8  ;;  %v1544_v13 = vunpack.c.h.bf16 %v1681_v8  ;;  %v1684_v29 = vld [vmem:[%s1928_s11 + $0x20] sm:$0xff]   ;;  %v1685_v33 = vld [vmem:[%s1928_s11 + $0x28] sm:$0xff]  }
  0x13   : > { %v1547_v14 = vunpack.c.l.bf16 %v1682_v9  ;;  %v1548_v15 = vunpack.c.h.bf16 %v1682_v9  ;;  %v1551_v18 = vunpack.c.l.bf16 %v1683_v10  ;;  %v1552_v19 = vunpack.c.h.bf16 %v1683_v10  ;;  %v1686_v42 = vld [vmem:[%s1928_s11 + $0x30] sm:$0xff]   ;;  %v1974_v48 = vld [vmem:[%s1928_s11 + $0x38] sm:$0xff]   ;;  %v1688_v60 = vld [vmem:[%s1928_s11 + $0x40] sm:$0xff]  }
  0x14   : > { %v499_v16 = vmul.f32 %v1539_v6, %v1937_v5  ;;  %v500_v17 = vmul.f32 %v1540_v7, %v1937_v5  ;;  %v501_v21 = vmul.f32 %v1543_v12, %v1937_v5  ;;  %v502_v22 = vmul.f32 %v1544_v13, %v1937_v5  ;;  %1742 = vmatpush3.bf16.msra.mxu0 %v1826_v3  ;;  %v1690_v9 = vld [vmem:[%s1928_s11 + $0x50] sm:$0xff]  }
  0x15   : > { %v503_v23 = vmul.f32 %v1547_v14, %v1937_v5  ;;  %v504_v24 = vmul.f32 %v1548_v15, %v1937_v5  ;;  %v505_v27 = vmul.f32 %v1551_v18, %v1937_v5  ;;  %v506_v28 = vmul.f32 %v1552_v19, %v1937_v5  ;;  %1794 = vmatpush3.bf16.msra.mxu1 %v1826_v3  ;;  %v1689_v3 = vld [vmem:[%s1928_s11 + $0x48] sm:$0xff]   ;;  %v1691_v19 = vld [vmem:[%s1928_s11 + $0x58] sm:$0xff]  }
  0x16   : > { %v538_v25 = vadd.f32 %v1945_v11, %v499_v16  ;;  %v539_v26 = vadd.f32 %v1945_v11, %v500_v17  ;;  %v540_v32 = vadd.f32 %v1945_v11, %v501_v21  ;;  %1743 = vmatprep.subr.bf16.mxu0 %v1827_v20  ;;  %v541_v35 = vadd.f32 %v1945_v11, %v502_v22 }
  0x17   : > { %v542_v36 = vadd.f32 %v1945_v11, %v503_v23  ;;  %v543_v37 = vadd.f32 %v1945_v11, %v504_v24  ;;  %1787 = vmatprep.subr.bf16.mxu1 %v1827_v20  ;;  %v544_v39 = vadd.f32 %v1945_v11, %v505_v27  ;;  %v545_v40 = vadd.f32 %v1945_v11, %v506_v28 }
  0x18   : > { %v570_v30 = vmax.f32 %v538_v25, 0.0  ;;  %v571_v31 = vmax.f32 %v539_v26, 0.0  ;;  %v1555_v41 = vunpack.c.l.bf16 %v1684_v29  ;;  %v1556_v43 = vunpack.c.h.bf16 %v1684_v29  ;;  %1744 = vmatpush3.bf16.msra.mxu0 %v1827_v20 }
  0x19   : > { %v1559_v44 = vunpack.c.l.bf16 %v1685_v33  ;;  %v572_v45 = vmax.f32 %v540_v32, 0.0  ;;  %v1560_v47 = vunpack.c.h.bf16 %v1685_v33  ;;  %1745 = vmatprep.subr.bf16.mxu0 %v1828_v34  ;;  %v573_v50 = vmax.f32 %v541_v35, 0.0  ;;  %1795 = vmatpush3.bf16.msra.mxu1 %v1827_v20  ;;  %v1692_v32 = vld [vmem:[%s1928_s11 + $0x60] sm:$0xff]  }
  0x1a   : > { %v634_v38 = vpack.c.bf16 %v571_v31, %v570_v30  ;;  %v507_v46 = vmul.f32 %v1555_v41, %v1937_v5  ;;  %v574_v51 = vmax.f32 %v542_v36, 0.0  ;;  %v575_v52 = vmax.f32 %v543_v37, 0.0  ;;  %1788 = vmatprep.subr.bf16.mxu1 %v1828_v34 }
  0x1b   : > { %v1563_v53 = vunpack.c.l.bf16 %v1686_v42  ;;  %v576_v54 = vmax.f32 %v544_v39, 0.0  ;;  %v577_v55 = vmax.f32 %v545_v40, 0.0  ;;  %v508_v56 = vmul.f32 %v1556_v43, %v1937_v5 }
  0x1c   : > { %1751 = vmatprep.mubr.bf16.mxu0 %v634_v38  ;;  %v509_v57 = vmul.f32 %v1559_v44, %v1937_v5  ;;  %v1564_v58 = vunpack.c.h.bf16 %v1686_v42  ;;  %v1567_v59 = vunpack.c.l.bf16 %v1974_v48  ;;  %1746 = vmatpush3.bf16.msra.mxu0 %v1828_v34  ;;  %v1984_v61 = vadd.f32 %v1945_v11, %v507_v46 }
  0x1d   : > { %v510_v62 = vmul.f32 %v1560_v47, %v1937_v5  ;;  %1747 = vmatprep.subr.bf16.mxu0 %v1829_v49  ;;  %v635_v0 = vpack.c.bf16 %v573_v50, %v572_v45  ;;  %v636_v1 = vpack.c.bf16 %v575_v52, %v574_v51  ;;  %1796 = vmatpush3.bf16.msra.mxu1 %v1828_v34  ;;  %v1568_v7 = vunpack.c.h.bf16 %v1974_v48  ;;  %v1693_v45 = vld [vmem:[%s1928_s11 + $0x68] sm:$0xff]  }
  0x1e   : > { %v511_v2 = vmul.f32 %v1563_v53, %v1937_v5  ;;  %v1992_v4 = vpack.c.bf16 %v577_v55, %v576_v54  ;;  %v1995_v6 = vadd.f32 %v1945_v11, %v508_v56  ;;  %1789 = vmatprep.subr.bf16.mxu1 %v1829_v49  ;;  %v1571_v8 = vunpack.c.l.bf16 %v1688_v60  ;;  %v1694_v55 = vld [vmem:[%s1928_s11 + $0x70] sm:$0xff]  }
  0x1f   : > { %v2000_v10 = vadd.f32 %v1945_v11, %v509_v57  ;;  %v2003_v12 = vmul.f32 %v1564_v58, %v1937_v5  ;;  %v2006_v13 = vmul.f32 %v1567_v59, %v1937_v5  ;;  %v1572_v14 = vunpack.c.h.bf16 %v1688_v60 }
  0x20   : > { %1748 = vmatpush3.bf16.msra.mxu0 %v1829_v49  ;;  %v578_v15 = vmax.f32 %v1984_v61, 0.0  ;;  %v2010_v16 = vadd.f32 %v1945_v11, %v510_v62  ;;  %v515_v17 = vmul.f32 %v1571_v8, %v1937_v5  ;;  %v1575_v18 = vunpack.c.l.bf16 %v1689_v3 }
  0x21   : > { %1749 = vmatprep.subr.bf16.mxu0 %v1830_v63  ;;  %1797 = vmatpush3.bf16.msra.mxu1 %v1829_v49  ;;  %v2015_v20 = vadd.f32 %v1945_v11, %v511_v2  ;;  %v516_v21 = vmul.f32 %v1572_v14, %v1937_v5  ;;  %v1576_v22 = vunpack.c.h.bf16 %v1689_v3  ;;  %v1579_v23 = vunpack.c.l.bf16 %v1690_v9 }
  0x22   : > { %v579_v24 = vmax.f32 %v1995_v6, 0.0  ;;  %1790 = vmatprep.subr.bf16.mxu1 %v1830_v63  ;;  %v554_v25 = vadd.f32 %v1945_v11, %v515_v17  ;;  %v517_v26 = vmul.f32 %v1575_v18, %v1937_v5  ;;  %v1580_v27 = vunpack.c.h.bf16 %v1690_v9  ;;  %v1695_v17 = vld [vmem:[%s1928_s11 + $0x78] sm:$0xff]  }
  0x23   : > { %v555_v28 = vadd.f32 %v1945_v11, %v516_v21  ;;  %v518_v29 = vmul.f32 %v1576_v22, %v1937_v5  ;;  %v519_v30 = vmul.f32 %v1579_v23, %v1937_v5  ;;  %v1583_v31 = vunpack.c.l.bf16 %v1691_v19 }
  0x24   : > { %1750 = vmatpush3.bf16.msra.mxu0 %v1830_v63  ;;  %v586_v33 = vmax.f32 %v554_v25, 0.0  ;;  %v556_v34 = vadd.f32 %v1945_v11, %v517_v26  ;;  %v520_v35 = vmul.f32 %v1580_v27, %v1937_v5  ;;  %v1584_v36 = vunpack.c.h.bf16 %v1691_v19 }
  0x25   : > { %1798 = vmatpush3.bf16.msra.mxu1 %v1830_v63  ;;  %v587_v37 = vmax.f32 %v555_v28, 0.0  ;;  %v557_v38 = vadd.f32 %v1945_v11, %v518_v29  ;;  %v558_v39 = vadd.f32 %v1945_v11, %v519_v30  ;;  %v521_v40 = vmul.f32 %v1583_v31, %v1937_v5 }
  0x26   : > { %v588_v41 = vmax.f32 %v556_v34, 0.0  ;;  %v559_v42 = vadd.f32 %v1945_v11, %v520_v35  ;;  %v522_v43 = vmul.f32 %v1584_v36, %v1937_v5  ;;  %v1587_v44 = vunpack.c.l.bf16 %v1692_v32 }
  0x27   : > { %1752 = vmatmul.mubr.bf16.vlgmr.msra.gmra.mrb[0].mxu0 %v635_v0  ;;  %v642_v46 = vpack.c.bf16 %v587_v37, %v586_v33  ;;  %v589_v47 = vmax.f32 %v557_v38, 0.0  ;;  %v590_v49 = vmax.f32 %v558_v39, 0.0  ;;  %v560_v50 = vadd.f32 %v1945_v11, %v521_v40 }
  0x28   : > { %1755 = vmatprep.mubr.bf16.mxu0 %v636_v1  ;;  %v591_v51 = vmax.f32 %v559_v42, 0.0  ;;  %v561_v52 = vadd.f32 %v1945_v11, %v522_v43  ;;  %v1588_v53 = vunpack.c.h.bf16 %v1692_v32  ;;  %v523_v54 = vmul.f32 %v1587_v44, %v1937_v5 }
  0x29   : > { %1767 = vmatprep.mubr.bf16.mxu1 %v642_v46  ;;  %v643_v56 = vpack.c.bf16 %v589_v47, %v588_v41  ;;  %v592_v57 = vmax.f32 %v560_v50, 0.0  ;;  %v1591_v58 = vunpack.c.l.bf16 %v1693_v45  ;;  %v1592_v59 = vunpack.c.h.bf16 %v1693_v45 }
  0x2a   : > { %v644_v60 = vpack.c.bf16 %v591_v51, %v590_v49  ;;  %v593_v61 = vmax.f32 %v561_v52, 0.0  ;;  %v524_v62 = vmul.f32 %v1588_v53, %v1937_v5  ;;  %v562_v63 = vadd.f32 %v1945_v11, %v523_v54 }
  0x2b   : > { %1768 = vmatmul.mubr.bf16.vlgmr.msra.gmra.mrb[0].mxu1 %v643_v56  ;;  %v525_v0 = vmul.f32 %v1591_v58, %v1937_v5  ;;  %v526_v1 = vmul.f32 %v1592_v59, %v1937_v5  ;;  %v1595_v2 = vunpack.c.l.bf16 %v1694_v55  ;;  %v1596_v3 = vunpack.c.h.bf16 %v1694_v55 }
  0x2c   : > { %v638_v6 = vpack.c.bf16 %v579_v24, %v578_v15  ;;  %v551_v8 = vadd.f32 %v1945_v11, %v2003_v12  ;;  %1771 = vmatprep.mubr.bf16.mxu1 %v644_v60  ;;  %v563_v9 = vadd.f32 %v1945_v11, %v524_v62  ;;  %v594_v14 = vmax.f32 %v562_v63, 0.0 }
  0x2d   : > { %v580_v18 = vmax.f32 %v2000_v10, 0.0  ;;  %v514_v19 = vmul.f32 %v1568_v7, %v1937_v5  ;;  %v527_v21 = vmul.f32 %v1595_v2, %v1937_v5  ;;  %v528_v22 = vmul.f32 %v1596_v3, %v1937_v5 }
  0x2e   : > { %v581_v15 = vmax.f32 %v2010_v16, 0.0  ;;  %v582_v23 = vmax.f32 %v2015_v20, 0.0  ;;  %v645_v12 = vpack.c.bf16 %v593_v61, %v592_v57  ;;  %v595_v24 = vmax.f32 %v563_v9, 0.0 }
  0x2f   : > { %1756 = vmatmul.mubr.bf16.gmra.mrb[4].mxu0 %v1992_v4  ;;  %v564_v25 = vadd.f32 %v1945_v11, %v525_v0  ;;  %v565_v10 = vadd.f32 %v1945_v11, %v526_v1  ;;  %v1599_v26 = vunpack.c.l.bf16 %v1695_v17  ;;  %v1600_v27 = vunpack.c.h.bf16 %v1695_v17 }
  0x30   : > { %1759 = vmatprep.mubr.bf16.mxu0 %v638_v6  ;;  %v583_v48 = vmax.f32 %v551_v8, 0.0  ;;  %v646_v7 = vpack.c.bf16 %v595_v24, %v594_v14  ;;  %v566_v28 = vadd.f32 %v1945_v11, %v527_v21  ;;  %v567_v29 = vadd.f32 %v1945_v11, %v528_v22 }
  0x31   : > { %v639_v16 = vpack.c.bf16 %v581_v15, %v580_v18  ;;  %v552_v20 = vadd.f32 %v1945_v11, %v2006_v13  ;;  %v553_v30 = vadd.f32 %v1945_v11, %v514_v19  ;;  %v596_v4 = vmax.f32 %v564_v25, 0.0 }
  0x32   : > { %v597_v31 = vmax.f32 %v565_v10, 0.0  ;;  %v529_v32 = vmul.f32 %v1599_v26, %v1937_v5  ;;  %v530_v33 = vmul.f32 %v1600_v27, %v1937_v5  ;;  %v640_v34 = vpack.c.bf16 %v583_v48, %v582_v23 }
  0x33   : > { %1772 = vmatmul.mubr.bf16.gmra.mrb[4].mxu1 %v645_v12  ;;  %v598_v35 = vmax.f32 %v566_v28, 0.0  ;;  %v599_v36 = vmax.f32 %v567_v29, 0.0  ;;  %v584_v37 = vmax.f32 %v552_v20, 0.0  ;;  %v585_v38 = vmax.f32 %v553_v30, 0.0 }
  0x34   : > { %1775 = vmatprep.mubr.bf16.mxu1 %v646_v7  ;;  %v647_v39 = vpack.c.bf16 %v597_v31, %v596_v4  ;;  %v568_v13 = vadd.f32 %v1945_v11, %v529_v32  ;;  %v569_v40 = vadd.f32 %v1945_v11, %v530_v33 }
  0x35   : > { %v648_v41 = vpack.c.bf16 %v599_v36, %v598_v35  ;;  %v641_v42 = vpack.c.bf16 %v585_v38, %v584_v37 }
  0x36   : > { %v600_v43 = vmax.f32 %v568_v13, 0.0  ;;  %v601_v44 = vmax.f32 %v569_v40, 0.0 }
  0x37   : > { %1760 = vmatmul.mubr.bf16.gmra.mrb[8].mxu0 %v639_v16 }
  0x38   : > { %1763 = vmatprep.mubr.bf16.mxu0 %v640_v34  ;;  %v649_v5 = vpack.c.bf16 %v601_v44, %v600_v43 }
  0x3b   : > { %1776 = vmatmul.mubr.bf16.gmra.mrb[8].mxu1 %v647_v39 }
  0x3c   : > { %1779 = vmatprep.mubr.bf16.mxu1 %v648_v41 }
  0x3f   : > { %1764 = vmatmul.mubr.bf16.gmra.mrb[12].mxu0 %v641_v42 }
  0x43   : > { %1780 = vmatmul.mubr.bf16.gmra.mrb[12].mxu1 %v649_v5 }
  0xfa   : > { %v1753_v45 = vpop.f32.mrb[0].mxu0 }
  0xfb   : > { %v748_v46 = vpop.f32.mrb[1].mxu0  ;;  %v1173_v56 = vmul.f32 %v1753_v45, %v1753_v45 }
  0xfc   : > { %v1754_v11 = vpop.f32.mrb[2].mxu0  ;;  %v1171_v50 = vmul.f32 %v748_v46, %v748_v46 }
  0xfd   : > { %v1609_v47 = vpack.c.bf16 %v1754_v11, %v1753_v45  ;;  %v751_v49 = vpop.f32.mrb[3].mxu0  ;;  %v1174_v62 = vmul.f32 %v1754_v11, %v1754_v11 }
  0xfe   : > { %v1604_v51 = vpack.c.bf16 %v751_v49, %v748_v46  ;;  %v1134_v52 = vadd.f32 %v751_v49, %v748_v46  ;;  %v1172_v53 = vmul.f32 %v751_v49, %v751_v49  ;;  %v2072_v54 = vpop.f32.mrb[0].mxu1 }
  0xff   : > { %1696 = vst [vmem:[%s2070_s10 + $0x8] sm:$0xff] %v1609_v47   ;;  %v2075_v55 = vpop.f32.mrb[1].mxu1 }
 0x100   : > { %1605 = vst [vmem:[%s2070_s10] sm:$0xff] %v1604_v51   ;;  %v1135_v57 = vadd.f32 %v1753_v45, %v1134_v52  ;;  %v1203_v58 = vadd.f32 %v1172_v53, %v1171_v50  ;;  %v2078_v59 = vpop.f32.mrb[2].mxu1 }
 0x101   : > { %v1649_v60 = vpack.c.bf16 %v2078_v59, %v2072_v54  ;;  %v2082_v61 = vpop.f32.mrb[3].mxu1 }
 0x102   : > { %v1204_v63 = vadd.f32 %v1203_v58, %v1173_v56  ;;  %v1757_v0 = vpop.f32.mrb[4].mxu0  ;;  %v1136_v1 = vadd.f32 %v1754_v11, %v1135_v57  ;;  %v1644_v2 = vpack.c.bf16 %v2082_v61, %v2075_v55 }
 0x103   : > { %v764_v3 = vpop.f32.mrb[5].mxu0  ;;  %1704 = vst [vmem:[%s2070_s10 + $0x48] sm:$0xff] %v1649_v60   ;;  %v1177_v24 = vmul.f32 %v1757_v0, %v1757_v0 }
 0x104   : > { %v1137_v6 = vadd.f32 %v1136_v1, %v764_v3  ;;  %v1175_v8 = vmul.f32 %v764_v3, %v764_v3  ;;  %v1205_v9 = vadd.f32 %v1204_v63, %v1174_v62  ;;  %v1758_v14 = vpop.f32.mrb[6].mxu0  ;;  %1703 = vst [vmem:[%s2070_s10 + $0x40] sm:$0xff] %v1644_v2  }
 0x105   : > { %v1619_v17 = vpack.c.bf16 %v1758_v14, %v1757_v0  ;;  %v767_v18 = vpop.f32.mrb[7].mxu0  ;;  %v1178_v7 = vmul.f32 %v1758_v14, %v1758_v14 }
 0x106   : > { %v1206_v19 = vadd.f32 %v1205_v9, %v1175_v8  ;;  %v1614_v21 = vpack.c.bf16 %v767_v18, %v764_v3  ;;  %v1138_v22 = vadd.f32 %v1137_v6, %v767_v18  ;;  %v1176_v15 = vmul.f32 %v767_v18, %v767_v18  ;;  %v2088_v23 = vpop.f32.mrb[4].mxu1 }
 0x107   : > { %1698 = vst [vmem:[%s2070_s10 + $0x18] sm:$0xff] %v1619_v17   ;;  %v2091_v12 = vpop.f32.mrb[5].mxu1  ;;  %v1187_v17 = vmul.f32 %v2075_v55, %v2075_v55 }
 0x108   : > { %1697 = vst [vmem:[%s2070_s10 + $0x10] sm:$0xff] %v1614_v21   ;;  %v1139_v25 = vadd.f32 %v1757_v0, %v1138_v22  ;;  %v1207_v10 = vadd.f32 %v1206_v19, %v1176_v15  ;;  %v2094_v26 = vpop.f32.mrb[6].mxu1 }
 0x109   : > { %v1659_v27 = vpack.c.bf16 %v2094_v26, %v2088_v23  ;;  %v2098_v48 = vpop.f32.mrb[7].mxu1 }
 0x10a   : > { %v1208_v28 = vadd.f32 %v1207_v10, %v1177_v24  ;;  %v1761_v29 = vpop.f32.mrb[8].mxu0  ;;  %v1140_v16 = vadd.f32 %v1758_v14, %v1139_v25  ;;  %v1654_v20 = vpack.c.bf16 %v2098_v48, %v2091_v12 }
 0x10b   : > { %v780_v30 = vpop.f32.mrb[9].mxu0  ;;  %1706 = vst [vmem:[%s2070_s10 + $0x58] sm:$0xff] %v1659_v27   ;;  %v1181_v41 = vmul.f32 %v1761_v29, %v1761_v29 }
 0x10c   : > { %v1141_v4 = vadd.f32 %v1140_v16, %v780_v30  ;;  %v1179_v31 = vmul.f32 %v780_v30, %v780_v30  ;;  %v1209_v32 = vadd.f32 %v1208_v28, %v1178_v7  ;;  %v1762_v33 = vpop.f32.mrb[10].mxu0  ;;  %1705 = vst [vmem:[%s2070_s10 + $0x50] sm:$0xff] %v1654_v20   ;;  %v1188_v28 = vmul.f32 %v2082_v61, %v2082_v61 }
 0x10d   : > { %v1629_v34 = vpack.c.bf16 %v1762_v33, %v1761_v29  ;;  %v783_v35 = vpop.f32.mrb[11].mxu0  ;;  %v1182_v46 = vmul.f32 %v1762_v33, %v1762_v33 }
 0x10e   : > { %v1210_v36 = vadd.f32 %v1209_v32, %v1179_v31  ;;  %v1624_v37 = vpack.c.bf16 %v783_v35, %v780_v30  ;;  %v1142_v38 = vadd.f32 %v1141_v4, %v783_v35  ;;  %v1180_v39 = vmul.f32 %v783_v35, %v783_v35  ;;  %v2104_v13 = vpop.f32.mrb[8].mxu1 }
 0x10f   : > { %1700 = vst [vmem:[%s2070_s10 + $0x28] sm:$0xff] %v1629_v34   ;;  %v2107_v40 = vpop.f32.mrb[9].mxu1  ;;  %v1190_v30 = vmul.f32 %v2078_v59, %v2078_v59  ;;  %v1191_v31 = vmul.f32 %v2091_v12, %v2091_v12  ;;  %v1192_v35 = vmul.f32 %v2098_v48, %v2098_v48 }
 0x110   : > { %1699 = vst [vmem:[%s2070_s10 + $0x20] sm:$0xff] %v1624_v37   ;;  %v1143_v42 = vadd.f32 %v1761_v29, %v1142_v38  ;;  %v1211_v43 = vadd.f32 %v1210_v36, %v1180_v39  ;;  %v2110_v44 = vpop.f32.mrb[10].mxu1  ;;  %v1189_v29 = vmul.f32 %v2072_v54, %v2072_v54 }
 0x111   : > { %v1669_v5 = vpack.c.bf16 %v2110_v44, %v2104_v13  ;;  %v2114_v45 = vpop.f32.mrb[11].mxu1 }
 0x112   : > { %v1212_v11 = vadd.f32 %v1211_v43, %v1181_v41  ;;  %v1765_v47 = vpop.f32.mrb[12].mxu0  ;;  %v1144_v49 = vadd.f32 %v1762_v33, %v1143_v42  ;;  %v1664_v50 = vpack.c.bf16 %v2114_v45, %v2107_v40 }
 0x113   : > { %v796_v51 = vpop.f32.mrb[13].mxu0  ;;  %1708 = vst [vmem:[%s2070_s10 + $0x68] sm:$0xff] %v1669_v5   ;;  %v1185_v6 = vmul.f32 %v1765_v47, %v1765_v47  ;;  %v1196_v5 = vmul.f32 %v2114_v45, %v2114_v45 }
 0x114   : > { %v1145_v52 = vadd.f32 %v1144_v49, %v796_v51  ;;  %v1183_v53 = vmul.f32 %v796_v51, %v796_v51  ;;  %v1213_v56 = vadd.f32 %v1212_v11, %v1182_v46  ;;  %v1766_v57 = vpop.f32.mrb[14].mxu0  ;;  %1707 = vst [vmem:[%s2070_s10 + $0x60] sm:$0xff] %v1664_v50  }
 0x115   : > { %v1639_v58 = vpack.c.bf16 %v1766_v57, %v1765_v47  ;;  %v799_v60 = vpop.f32.mrb[15].mxu0  ;;  %v1186_v21 = vmul.f32 %v1766_v57, %v1766_v57 }
 0x116   : > { %v1214_v62 = vadd.f32 %v1213_v56, %v1183_v53  ;;  %v1634_v63 = vpack.c.bf16 %v799_v60, %v796_v51  ;;  %v1146_v0 = vadd.f32 %v1145_v52, %v799_v60  ;;  %v1184_v1 = vmul.f32 %v799_v60, %v799_v60  ;;  %v1781_v2 = vpop.f32.mrb[12].mxu1 }
 0x117   : > { %1702 = vst [vmem:[%s2070_s10 + $0x38] sm:$0xff] %v1639_v58   ;;  %v860_v3 = vpop.f32.mrb[13].mxu1  ;;  %v1201_v56 = vmul.f32 %v1781_v2, %v1781_v2 }
 0x118   : > { %1701 = vst [vmem:[%s2070_s10 + $0x30] sm:$0xff] %v1634_v63   ;;  %v1147_v8 = vadd.f32 %v1765_v47, %v1146_v0  ;;  %v1215_v9 = vadd.f32 %v1214_v62, %v1184_v1  ;;  %v1782_v14 = vpop.f32.mrb[14].mxu1  ;;  %v1199_v49 = vmul.f32 %v860_v3, %v860_v3 }
 0x119   : > { %v1679_v18 = vpack.c.bf16 %v1782_v14, %v1781_v2  ;;  %v863_v19 = vpop.f32.mrb[15].mxu1  ;;  %v1202_v60 = vmul.f32 %v1782_v14, %v1782_v14 }
 0x11a   : > { %v1216_v22 = vadd.f32 %v1215_v9, %v1185_v6  ;;  %v1148_v15 = vadd.f32 %v1766_v57, %v1147_v8  ;;  %v1674_v24 = vpack.c.bf16 %v863_v19, %v860_v3 }
 0x11b   : > { %1710 = vst [vmem:[%s2070_s10 + $0x78] sm:$0xff] %v1679_v18  }
 0x11c   : > { %v1149_v25 = vadd.f32 %v1148_v15, %v2075_v55  ;;  %v1217_v10 = vadd.f32 %v1216_v22, %v1186_v21  ;;  %1709 = vst [vmem:[%s2070_s10 + $0x70] sm:$0xff] %v1674_v24  }
 0x11e   : > { %v1218_v27 = vadd.f32 %v1217_v10, %v1187_v17  ;;  %v1150_v7 = vadd.f32 %v1149_v25, %v2082_v61 }
 0x120   : > { %v1151_v16 = vadd.f32 %v2072_v54, %v1150_v7  ;;  %v1219_v20 = vadd.f32 %v1218_v27, %v1188_v28  ;;  %v1193_v54 = vmul.f32 %v2088_v23, %v2088_v23 }
 0x122   : > { %v1220_v4 = vadd.f32 %v1219_v20, %v1189_v29  ;;  %v1152_v55 = vadd.f32 %v2078_v59, %v1151_v16  ;;  %v1194_v59 = vmul.f32 %v2094_v26, %v2094_v26 }
 0x124   : > { %v1153_v32 = vadd.f32 %v1152_v55, %v2091_v12  ;;  %v1221_v33 = vadd.f32 %v1220_v4, %v1190_v30  ;;  %v1195_v12 = vmul.f32 %v2107_v40, %v2107_v40 }
 0x126   : > { %v1222_v34 = vadd.f32 %v1221_v33, %v1191_v31  ;;  %v1154_v61 = vadd.f32 %v1153_v32, %v2098_v48 }
 0x128   : > { %v1155_v36 = vadd.f32 %v2088_v23, %v1154_v61  ;;  %v1223_v37 = vadd.f32 %v1222_v34, %v1192_v35  ;;  %v1197_v23 = vmul.f32 %v2104_v13, %v2104_v13 }
 0x12a   : > { %v1224_v38 = vadd.f32 %v1223_v37, %v1193_v54  ;;  %v1156_v39 = vadd.f32 %v2094_v26, %v1155_v36  ;;  %v1198_v26 = vmul.f32 %v2110_v44, %v2110_v44 }
 0x12c   : > { %v1157_v41 = vadd.f32 %v1156_v39, %v2107_v40  ;;  %v1225_v42 = vadd.f32 %v1224_v38, %v1194_v59 }
 0x12e   : > { %v1226_v43 = vadd.f32 %v1225_v42, %v1195_v12  ;;  %v1158_v48 = vadd.f32 %v1157_v41, %v2114_v45  ;;  %v1200_v45 = vmul.f32 %v863_v19, %v863_v19 }
 0x130   : > { %v1159_v46 = vadd.f32 %v2104_v13, %v1158_v48  ;;  %v1227_v11 = vadd.f32 %v1226_v43, %v1196_v5 }
 0x132   : > { %v1228_v47 = vadd.f32 %v1227_v11, %v1197_v23  ;;  %v1160_v40 = vadd.f32 %v2110_v44, %v1159_v46 }
 0x134   : > { %v1161_v50 = vadd.f32 %v1160_v40, %v860_v3  ;;  %v1229_v51 = vadd.f32 %v1228_v47, %v1198_v26 }
 0x136   : > { %v1230_v52 = vadd.f32 %v1229_v51, %v1199_v49  ;;  %v1162_v53 = vadd.f32 %v1161_v50, %v863_v19 }
 0x138   : > { %v1163_v57 = vadd.f32 %v1781_v2, %v1162_v53  ;;  %v1231_v58 = vadd.f32 %v1230_v52, %v1200_v45 }
 0x13a   : > { %v1164_v13 = vadd.f32 %v1782_v14, %v1163_v57  ;;  %v1232_v62 = vadd.f32 %v1231_v58, %v1201_v56 }
 0x13c   : > { %v1165_v63 = vrot.slane %v1164_v13, 4  ;;  %v1233_v0 = vadd.f32 %v1232_v62, %v1202_v60 }
 0x13e   : > { %v1166_v1 = vadd.f32 %v1165_v63, %v1164_v13  ;;  %v1234_v6 = vrot.slane %v1233_v0, 4 }
 0x140   : > { %v1167_v44 = vrot.slane %v1166_v1, 2  ;;  %v1235_v8 = vadd.f32 %v1234_v6, %v1233_v0 }
 0x142   : > { %v1168_v3 = vadd.f32 %v1167_v44, %v1166_v1  ;;  %v1236_v9 = vrot.slane %v1235_v8, 2 }
 0x144   : > { %v1169_v17 = vrot.slane %v1168_v3, 1  ;;  %v1237_v18 = vadd.f32 %v1236_v9, %v1235_v8 }
 0x146   : > { %v1170_v2 = vadd.f32 %v1169_v17, %v1168_v3  ;;  %v1238_v19 = vrot.slane %v1237_v18, 1 }
 0x148   : > { %v1239_v14 = vadd.f32 %v1238_v19, %v1237_v18  ;;  %1240 = vst [vmem:[%s383_s12] sm:$0xff] %v1170_v2 }
 0x14a   : > { %1241 = vst [vmem:[%s390_s15] sm:$0xff] %v1239_v14 }
 0x14b PF: > { %s17_s23 = sadd.s32 1, %s1853_s23   ;;  %s2184_s21 = smov %s1849_s22 }
 0x14c   : > { %p14_p6 = scmp.ge.s32.totalorder %s17_s23, 4   ;;  %s2185_s22 = smov %s2187_s24 }
 0x14e   :  { %16 = sbr.rel (!%p14_p6) target bundleno = 2 (0x2), region = 107 }

</bundles_post_ra>
